<compile_context>
chip_gen: v6e
topology: v6e:2x2x1
jax: 0.10.0
libtpu: 0.0.40
codegen_flags: <defaults>
</compile_context>

<pallas_src>
import jax
import jax.numpy as jnp
from jax import lax
from jax.experimental import pallas as pl
from jax.experimental.pallas import tpu as pltpu

# ---- dimensions fixed by the PyTorch module -------------------------------------
NUM_FEATURES = 5000     # self.num_features
N_CODES      = 3        # self.n_diagnosis_codes
EMB_SIZE     = 8        # self.emb_size
N_NEW        = 256      # self.num_new_features (fc output channels)
H1           = 256      # first hidden width of self.mlp
H2           = 64
HIDDEN       = 16       # self.hidden_size
N_CLASSES    = 2        # self.num_classes
BN_EPS       = 1e-5

# feature axis padded to a lane multiple so the reduction can be tiled 128-dense
F_TILE = 1280
F_PAD  = 5120           # 4 * F_TILE >= NUM_FEATURES


# ==================================================================================
# Kernel 1: embedding-weighted code sum fused with Linear(5000 -> 256)
# ==================================================================================
def embed_fc_kernel(xt_ref, et_ref, w_ref, b_ref, h_ref):
    # xt_ref: (N_CODES, F_TILE)   one batch row, codes on sublanes, features on lanes
    # et_ref: (EMB_SIZE, N_CODES) embedding table (transposed), resident
    # w_ref : (F_TILE, N_NEW)     fc weight tile (input-major)
    # b_ref : (1, N_NEW)          fc bias
    # h_ref : (EMB_SIZE, N_NEW)   accumulator, resident across the feature grid axis
    @pl.when(pl.program_id(1) == 0)
    def _init():
        h_ref[...] = jnp.broadcast_to(b_ref[...], h_ref.shape)

    x3 = xt_ref[...]
    et = et_ref[...]
    # K == 3 contraction: keep it on the VPU (an MXU dot would be ~99% idle here).
    t = et[:, 0:1] * x3[0:1, :]
    for c in range(1, N_CODES):
        t = t + et[:, c:c + 1] * x3[c:c + 1, :]          # (EMB_SIZE, F_TILE)
    # heavy contraction over features: proper MXU matmul, f32 accumulation
    h_ref[...] += jnp.dot(t, w_ref[...], preferred_element_type=jnp.float32)


# ==================================================================================
# Kernel 2: BN(256)+ReLU -> flatten -> 3x (Linear + BN + ReLU) down to 16 hidden
# ==================================================================================
def mlp_tail_kernel(h_ref, g0_ref, be0_ref, w1_ref, b1_ref, g1_ref, be1_ref,
                    w2_ref, b2_ref, g2_ref, be2_ref, w3_ref, b3_ref, g3_ref, be3_ref,
                    o_ref):
    h = h_ref[...]                                       # (B, EMB_SIZE, N_NEW)
    bsz, esz, n0 = h.shape

    # BatchNorm1d(256): channel = fc output, stats over (batch, emb-position), biased var
    h2d  = h.reshape(bsz * esz, n0)                      # layout-free merge of major dims
    mu0  = jnp.mean(h2d, axis=0, keepdims=True)          # (1, N_NEW)
    var0 = jnp.mean((h2d - mu0) ** 2, axis=0, keepdims=True)
    inv0 = lax.rsqrt(var0 + BN_EPS)
    g0, be0 = g0_ref[...], be0_ref[...]

    # Linear(2048 -> 256) without materializing the flatten: torch flat index is
    # n * EMB_SIZE + e, so accumulate one (B, 256) x (256, 256) dot per emb position e.
    acc = jnp.zeros((bsz, w1_ref.shape[2]), jnp.float32)
    for e in range(esz):
        ye = jnp.maximum(g0 * (h_ref[:, e, :] - mu0) * inv0 + be0, 0.0)   # (B, N_NEW)
        acc = acc + jnp.dot(ye, w1_ref[e], preferred_element_type=jnp.float32)
    z1 = acc + b1_ref[...]

    def bn_relu(z, g_ref, b_ref):
        m = jnp.mean(z, axis=0, keepdims=True)
        v = jnp.mean((z - m) ** 2, axis=0, keepdims=True)
        return jnp.maximum(g_ref[...] * (z - m) * lax.rsqrt(v + BN_EPS) + b_ref[...], 0.0)

    y1 = bn_relu(z1, g1_ref, be1_ref)                                            # (B, 256)
    z2 = jnp.dot(y1, w2_ref[...], preferred_element_type=jnp.float32) + b2_ref[...]
    y2 = bn_relu(z2, g2_ref, be2_ref)                                            # (B, 64)
    z3 = jnp.dot(y2, w3_ref[...], preferred_element_type=jnp.float32) + b3_ref[...]
    o_ref[...] = bn_relu(z3, g3_ref, be3_ref)                                    # (B, 16)


# ==================================================================================
# Kernel 3: lane-dense Linear(16 -> 2) + softmax head (the perf-review target)
# ==================================================================================
def head_kernel(w_ref, b_ref, x_ref, o_ref):
    # w_ref: (2, 16) f32 in SMEM   b_ref: (2,) f32 in SMEM
    # x_ref: (16, TB) f32 in VMEM (batch on lanes)   o_ref: (2, TB) f32 in VMEM
    x = x_ref[...]
    tb = x.shape[1]
    l0 = jnp.zeros((1, tb), jnp.float32)
    l1 = jnp.zeros((1, tb), jnp.float32)
    # K=16 / N=2 contraction: scalar-broadcast VPU FMAs.  The MXU would be ~99% idle
    # for this shape and only add result-FIFO drain latency.
    for hh in range(x.shape[0]):
        xr = x[hh:hh + 1, :]                             # (1, TB) sublane row
        l0 = l0 + w_ref[0, hh] * xr
        l1 = l1 + w_ref[1, hh] * xr
    l0 = l0 + b_ref[0]
    l1 = l1 + b_ref[1]

    # 2-class softmax over two sublane rows: elementwise max/exp (VPU/EUP), approx
    # reciprocal + one Newton step instead of a divide; no cross-lane XLU reductions.
    m  = jnp.maximum(l0, l1)
    e0 = jnp.exp(l0 - m)
    e1 = jnp.exp(l1 - m)
    s  = e0 + e1                                         # in [1, 2]
    r  = pl.reciprocal(s, approx=True)
    r  = r * (2.0 - s * r)                               # Newton refinement -> ~f32 accuracy
    o_ref[0:1, :] = e0 * r
    o_ref[1:2, :] = e1 * r


def _head_forward(z, w4, b4, *, lane_tile=512):
    """z: (B, 16) -> (B, 2) softmax probabilities (batch re-laid onto lanes)."""
    B, H = z.shape
    C = w4.shape[0]
    # Batch on lanes; tile it and shard the tiles across TensorCores ("parallel").
    # Ragged last tile handled by zero padding (bias-only columns, finite, sliced off).
    # Even at lane_tile=2048 the double-buffered (16, TB)+(2, TB) f32 working set is
    # <300 KiB - far under v7x's 64 MiB VMEM (and v5e/v6e's 128 MiB).
    lane_tile = max(128, (lane_tile // 128) * 128)
    tb = min(lane_tile, ((B + 127) // 128) * 128)
    bpad = ((B + tb - 1) // tb) * tb

    zt = jnp.zeros((H, bpad), jnp.float32).at[:, :B].set(z.T)     # (16, Bpad)

    probs_t = pl.pallas_call(
        head_kernel,
        out_shape=jax.ShapeDtypeStruct((C, bpad), jnp.float32),
        grid_spec=pltpu.PrefetchScalarGridSpec(
            num_scalar_prefetch=0,
            grid=(bpad // tb,),
            in_specs=[
                pl.BlockSpec(memory_space=pltpu.MemorySpace.SMEM),   # w4 (2, 16)
                pl.BlockSpec(memory_space=pltpu.MemorySpace.SMEM),   # b4 (2,)
                pl.BlockSpec((H, tb), lambda i: (0, i)),
            ],
            out_specs=pl.BlockSpec((C, tb), lambda i: (0, i)),
        ),
        compiler_params=pltpu.CompilerParams(dimension_semantics=("parallel",)),
    )(w4, b4, zt)
    return probs_t[:, :B].T


# ==================================================================================
# Full forward
# ==================================================================================
def mlp_forward(x, p, *, lane_tile=512):
    """x: (B, 5000, 3) float32 -> (B, 2) softmax probabilities."""
    B = x.shape[0]

    # ---- stage 1+2: embedding-weighted code sum fused with Linear(5000 -> 256) ----
    xt = jnp.transpose(x, (0, 2, 1))                                   # (B, 3, F)
    xt = jnp.pad(xt, ((0, 0), (0, 0), (0, F_PAD - NUM_FEATURES)))
    wfc_t = jnp.pad(p["w_fc"].T, ((0, F_PAD - NUM_FEATURES), (0, 0)))  # (F_PAD, 256)
    h = pl.pallas_call(
        embed_fc_kernel,
        out_shape=jax.ShapeDtypeStruct((B, EMB_SIZE, N_NEW), jnp.float32),
        grid_spec=pltpu.PrefetchScalarGridSpec(
            num_scalar_prefetch=0,
            grid=(B, F_PAD // F_TILE),                  # reduction (features) axis last
            in_specs=[
                pl.BlockSpec((None, N_CODES, F_TILE), lambda b, f: (b, 0, f)),
                pl.BlockSpec((EMB_SIZE, N_CODES), lambda b, f: (0, 0)),
                pl.BlockSpec((F_TILE, N_NEW), lambda b, f: (f, 0)),
                pl.BlockSpec((1, N_NEW), lambda b, f: (0, 0)),
            ],
            out_specs=pl.BlockSpec((None, EMB_SIZE, N_NEW), lambda b, f: (b, 0, 0)),
        ),
        compiler_params=pltpu.CompilerParams(
            dimension_semantics=("parallel", "arbitrary")),
    )(xt, p["emb"].T, wfc_t, p["b_fc"].reshape(1, -1))

    # ---- stages 3-6: BN+ReLU MLP down to the 16-wide hidden ------------------------
    row = lambda v: v.reshape(1, -1)
    # W1 re-layout so flatten order k = n*EMB_SIZE + e is preserved: (e, n, out)
    w1t = jnp.transpose(p["w1"].reshape(H1, N_NEW, EMB_SIZE), (2, 1, 0))
    tail_args = (h,
                 row(p["g0"]), row(p["be0"]),
                 w1t, row(p["b1"]), row(p["g1"]), row(p["be1"]),
                 p["w2"].T, row(p["b2"]), row(p["g2"]), row(p["be2"]),
                 p["w3"].T, row(p["b3"]), row(p["g3"]), row(p["be3"]))

    def full_spec(a):
        idx = (0,) * a.ndim
        return pl.BlockSpec(a.shape, lambda i, _idx=idx: _idx)

    z16 = pl.pallas_call(
        mlp_tail_kernel,
        out_shape=jax.ShapeDtypeStruct((B, HIDDEN), jnp.float32),
        grid_spec=pltpu.PrefetchScalarGridSpec(
            num_scalar_prefetch=0,
            grid=(1,),
            in_specs=[full_spec(a) for a in tail_args],
            out_specs=pl.BlockSpec((B, HIDDEN), lambda i: (0, 0)),
        ),
        compiler_params=pltpu.CompilerParams(dimension_semantics=("arbitrary",)),
    )(*tail_args)

    # ---- stage 7: lane-dense Linear(16 -> 2) + softmax -----------------------------
    return _head_forward(z16, p["w4"], p["b4"], lane_tile=lane_tile)


# ==================================================================================
# Parameters (deterministic, mimicking PyTorch default init) and pure-JAX reference
# ==================================================================================
def init_params(key):
    ks = jax.random.split(key, 6)

    def linear(k, fan_out, fan_in):
        kw, kb = jax.random.split(k)
        bound = 1.0 / jnp.sqrt(jnp.float32(fan_in))
        w = jax.random.uniform(kw, (fan_out, fan_in), jnp.float32, -bound, bound)
        b = jax.random.uniform(kb, (fan_out,), jnp.float32, -bound, bound)
        return w, b

    # nn.Embedding(3, 8, padding_idx=-1, max_norm=1.0): N(0,1) init, padding row
    # (index 2) zeroed; max_norm renorm happens at lookup time and every row is
    # looked up in forward(), so fold it into the effective table here.
    emb = jax.random.normal(ks[0], (N_CODES, EMB_SIZE), jnp.float32)
    emb = emb.at[N_CODES - 1].set(0.0)          # padding_idx = -1 -> row 2
    nrm = jnp.sqrt(jnp.sum(emb * emb, axis=1, keepdims=True))
    emb = jnp.where(nrm > 1.0, emb / jnp.maximum(nrm, 1e-7), emb)

    w_fc, b_fc = linear(ks[1], N_NEW, NUM_FEATURES)
    w1, b1 = linear(ks[2], H1, N_NEW * EMB_SIZE)
    w2, b2 = linear(ks[3], H2, H1)
    w3, b3 = linear(ks[4], HIDDEN, H2)
    w4, b4 = linear(ks[5], N_CLASSES, HIDDEN)

    bn = lambda c: (jnp.ones((c,), jnp.float32), jnp.zeros((c,), jnp.float32))
    g0, be0 = bn(N_NEW)
    g1, be1 = bn(H1)
    g2, be2 = bn(H2)
    g3, be3 = bn(HIDDEN)

    return dict(emb=emb, w_fc=w_fc, b_fc=b_fc,
                w1=w1, b1=b1, w2=w2, b2=b2, w3=w3, b3=b3, w4=w4, b4=b4,
                g0=g0, be0=be0, g1=g1, be1=be1, g2=g2, be2=be2, g3=g3, be3=be3)


def mlp_reference(x, p):
    """Pure-JAX mirror of MLP.forward (training-mode BatchNorm)."""
    B = x.shape[0]
    t = jnp.einsum("bfc,ce->bfe", x, p["emb"])                        # (B, F, 8)
    h = jnp.einsum("bfe,nf->ben", t, p["w_fc"]) + p["b_fc"]           # (B, 8, 256)
    hc = jnp.transpose(h, (0, 2, 1))                                  # (B, 256, 8)
    mu = jnp.mean(hc, axis=(0, 2), keepdims=True)
    var = jnp.mean((hc - mu) ** 2, axis=(0, 2), keepdims=True)
    y = jax.nn.relu(p["g0"].reshape(1, -1, 1) * (hc - mu) / jnp.sqrt(var + BN_EPS)
                    + p["be0"].reshape(1, -1, 1))
    v = y.reshape(B, -1)                                              # (B, 2048)

    def lin_bn_relu(v, w, b, g, be):
        z = v @ w.T + b
        m = jnp.mean(z, axis=0, keepdims=True)
        s = jnp.mean((z - m) ** 2, axis=0, keepdims=True)
        return jax.nn.relu(g * (z - m) / jnp.sqrt(s + BN_EPS) + be)

    v = lin_bn_relu(v, p["w1"], p["b1"], p["g1"], p["be1"])
    v = lin_bn_relu(v, p["w2"], p["b2"], p["g2"], p["be2"])
    v = lin_bn_relu(v, p["w3"], p["b3"], p["g3"], p["be3"])
    logits = v @ p["w4"].T + p["b4"]
    return jax.nn.softmax(logits, axis=1)


if __name__ == "__main__":
    key = jax.random.PRNGKey(0)
    kx, kp = jax.random.split(key)

    B = 4  # small batch (>= 2 so training-mode BatchNorm statistics are well defined)
    x = jax.random.normal(kx, (B, NUM_FEATURES, N_CODES), jnp.float32)
    params = init_params(kp)

    out = mlp_forward(x, params)
    out = jax.block_until_ready(out)

    ref = mlp_reference(x, params)
    assert out.shape == (B, N_CLASSES)
    assert bool(jnp.all(jnp.isfinite(out)))
    assert jnp.allclose(jnp.sum(out, axis=1), 1.0, atol=5e-4)
    assert jnp.allclose(out, ref, atol=1e-3, rtol=1e-3)

    print("KERNEL_OK")
</pallas_src>

<mosaic_0001>
module attributes {stable_mosaic.version = 11 : i64} {
  func.func @embed_fc_kernel(%arg0: i32, %arg1: i32, %arg2: memref<1x3x1280xf32, #tpu.memory_space<vmem>>, %arg3: memref<8x3xf32, #tpu.memory_space<vmem>>, %arg4: memref<1280x256xf32, #tpu.memory_space<vmem>>, %arg5: memref<1x256xf32, #tpu.memory_space<vmem>>, %arg6: memref<1x8x256xf32, #tpu.memory_space<vmem>>) attributes {dimension_semantics = [#tpu.dimension_semantics<parallel>, #tpu.dimension_semantics<arbitrary>], iteration_bounds = array<i64: 4, 4>, scalar_prefetch = 0 : i64, scratch_operands = 0 : i64, tpu.core_type = #tpu.core_type<tc>, window_params = [{transform_indices = @transform_0, window_bounds = array<i64: 1, 3, 1280>}, {pipeline_mode = #tpu.pipeline_mode<synchronous>, transform_indices = @transform_1, window_bounds = array<i64: 8, 3>}, {transform_indices = @transform_2, window_bounds = array<i64: 1280, 256>}, {pipeline_mode = #tpu.pipeline_mode<synchronous>, transform_indices = @transform_3, window_bounds = array<i64: 1, 256>}, {transform_indices = @transform_4, window_bounds = array<i64: 1, 8, 256>}]} {
    %c0_i32 = arith.constant 0 : i32
    %0 = arith.cmpi eq, %arg1, %c0_i32 : i32
    %1 = arith.extui %0 : i1 to i32
    %c0_i32_0 = arith.constant 0 : i32
    %2 = arith.cmpi ne, %1, %c0_i32_0 : i32
    scf.if %2 {
      %c0_13 = arith.constant 0 : index
      %c0_14 = arith.constant 0 : index
      %31 = vector.load %arg5[%c0_13, %c0_14] : memref<1x256xf32, #tpu.memory_space<vmem>>, vector<1x256xf32>
      %32 = vector.shape_cast %31 : vector<1x256xf32> to vector<1x256xf32>
      %33 = vector.broadcast %32 : vector<1x256xf32> to vector<8x256xf32>
      %c0_15 = arith.constant 0 : index
      %c0_16 = arith.constant 0 : index
      %c0_17 = arith.constant 0 : index
      %34 = vector.load %arg6[%c0_15, %c0_16, %c0_17] : memref<1x8x256xf32, #tpu.memory_space<vmem>>, vector<1x8x256xf32>
      %35 = vector.shape_cast %34 : vector<1x8x256xf32> to vector<8x256xf32>
      %36 = vector.shape_cast %33 : vector<8x256xf32> to vector<1x8x256xf32>
      tpu.vector_store %arg6[%c0_15, %c0_16, %c0_17], %36 {strides = array<i32>} : memref<1x8x256xf32, #tpu.memory_space<vmem>>, vector<1x8x256xf32>,
    } else {
    }
    %c0 = arith.constant 0 : index
    %c0_1 = arith.constant 0 : index
    %c0_2 = arith.constant 0 : index
    %3 = vector.load %arg2[%c0, %c0_1, %c0_2] : memref<1x3x1280xf32, #tpu.memory_space<vmem>>, vector<1x3x1280xf32>
    %4 = vector.shape_cast %3 : vector<1x3x1280xf32> to vector<3x1280xf32>
    %c0_3 = arith.constant 0 : index
    %c0_4 = arith.constant 0 : index
    %5 = vector.load %arg3[%c0_3, %c0_4] : memref<8x3xf32, #tpu.memory_space<vmem>>, vector<8x3xf32>
    %6 = vector.extract_strided_slice %5 {offsets = [0, 0], sizes = [8, 1], strides = [1, 1]} : vector<8x3xf32> to vector<8x1xf32>
    %7 = vector.extract_strided_slice %4 {offsets = [0, 0], sizes = [1, 1280], strides = [1, 1]} : vector<3x1280xf32> to vector<1x1280xf32>
    %8 = vector.broadcast %6 : vector<8x1xf32> to vector<8x1280xf32>
    %9 = vector.broadcast %7 : vector<1x1280xf32> to vector<8x1280xf32>
    %10 = arith.mulf %8, %9 : vector<8x1280xf32>
    %11 = vector.extract_strided_slice %5 {offsets = [0, 1], sizes = [8, 1], strides = [1, 1]} : vector<8x3xf32> to vector<8x1xf32>
    %12 = vector.extract_strided_slice %4 {offsets = [1, 0], sizes = [1, 1280], strides = [1, 1]} : vector<3x1280xf32> to vector<1x1280xf32>
    %13 = vector.broadcast %11 : vector<8x1xf32> to vector<8x1280xf32>
    %14 = vector.broadcast %12 : vector<1x1280xf32> to vector<8x1280xf32>
    %15 = arith.mulf %13, %14 : vector<8x1280xf32>
    %16 = arith.addf %10, %15 : vector<8x1280xf32>
    %17 = vector.extract_strided_slice %5 {offsets = [0, 2], sizes = [8, 1], strides = [1, 1]} : vector<8x3xf32> to vector<8x1xf32>
    %18 = vector.extract_strided_slice %4 {offsets = [2, 0], sizes = [1, 1280], strides = [1, 1]} : vector<3x1280xf32> to vector<1x1280xf32>
    %19 = vector.broadcast %17 : vector<8x1xf32> to vector<8x1280xf32>
    %20 = vector.broadcast %18 : vector<1x1280xf32> to vector<8x1280xf32>
    %21 = arith.mulf %19, %20 : vector<8x1280xf32>
    %22 = arith.addf %16, %21 : vector<8x1280xf32>
    %c0_5 = arith.constant 0 : index
    %c0_6 = arith.constant 0 : index
    %c0_7 = arith.constant 0 : index
    %23 = vector.load %arg6[%c0_5, %c0_6, %c0_7] : memref<1x8x256xf32, #tpu.memory_space<vmem>>, vector<1x8x256xf32>
    %24 = vector.shape_cast %23 : vector<1x8x256xf32> to vector<8x256xf32>
    %c0_8 = arith.constant 0 : index
    %c0_9 = arith.constant 0 : index
    %25 = vector.load %arg4[%c0_8, %c0_9] : memref<1280x256xf32, #tpu.memory_space<vmem>>, vector<1280x256xf32>
    %cst = arith.constant dense<0.000000e+00> : vector<8x256xf32>
    %26 = tpu.matmul %22, %25, %cst {dimension_numbers = #tpu.dot_dimension_numbers<[1], [0], [0], [1], [0, 0, 1, 1], [], []>} : vector<8x1280xf32>, vector<1280x256xf32>, vector<8x256xf32> -> vector<8x256xf32>
    %27 = arith.addf %24, %26 : vector<8x256xf32>
    %c0_10 = arith.constant 0 : index
    %c0_11 = arith.constant 0 : index
    %c0_12 = arith.constant 0 : index
    %28 = vector.load %arg6[%c0_10, %c0_11, %c0_12] : memref<1x8x256xf32, #tpu.memory_space<vmem>>, vector<1x8x256xf32>
    %29 = vector.shape_cast %28 : vector<1x8x256xf32> to vector<8x256xf32>
    %30 = vector.shape_cast %27 : vector<8x256xf32> to vector<1x8x256xf32>
    tpu.vector_store %arg6[%c0_10, %c0_11, %c0_12], %30 {strides = array<i32>} : memref<1x8x256xf32, #tpu.memory_space<vmem>>, vector<1x8x256xf32>,
    return
  }
  func.func @transform_0(%arg0: i32, %arg1: i32) -> (i32, i32, i32) {
    %c0_i32 = arith.constant 0 : i32
    %c0_i32_0 = arith.constant 0 : i32
    return %arg0, %c0_i32, %arg1 : i32, i32, i32
  }
  func.func @transform_1(%arg0: i32, %arg1: i32) -> (i32, i32) {
    %c0_i32 = arith.constant 0 : i32
    %c0_i32_0 = arith.constant 0 : i32
    %c0_i32_1 = arith.constant 0 : i32
    return %c0_i32, %c0_i32_0 : i32, i32
  }
  func.func @transform_2(%arg0: i32, %arg1: i32) -> (i32, i32) {
    %c0_i32 = arith.constant 0 : i32
    %c0_i32_0 = arith.constant 0 : i32
    return %arg1, %c0_i32 : i32, i32
  }
  func.func @transform_3(%arg0: i32, %arg1: i32) -> (i32, i32) {
    %c0_i32 = arith.constant 0 : i32
    %c0_i32_0 = arith.constant 0 : i32
    %c0_i32_1 = arith.constant 0 : i32
    return %c0_i32, %c0_i32_0 : i32, i32
  }
  func.func @transform_4(%arg0: i32, %arg1: i32) -> (i32, i32, i32) {
    %c0_i32 = arith.constant 0 : i32
    %c0_i32_0 = arith.constant 0 : i32
    %c0_i32_1 = arith.constant 0 : i32
    return %arg0, %c0_i32, %c0_i32_0 : i32, i32, i32
  }
}

</mosaic_0001>

<bundles_post_ra>
// kernel: tpu_custom_call.1
= control target key start
LH: loop header
LB: loop body
LE: loop exit
PB: predicated region body
PF: predicated region fallthrough
CT: control target
= control target key end

     0   :  { %s2455_s0 = inlined_call_operand.vmem [shape: f32[4,3,5120], index: 0, kind: input, shape index: {}]   ;;  %s2456_s1 = inlined_call_operand.vmem [shape: f32[8,3], index: 1, kind: input, shape index: {}]   ;;  %s2457_s2 = inlined_call_operand.hbm [shape: f32[5120,256], index: 2, kind: input, shape index: {}]   ;;  %s2458_s3 = inlined_call_operand.hbm [shape: f32[1,256], index: 3, kind: input, shape index: {}]   ;;  %s2459_s4 = inlined_call_operand.hbm [shape: f32[4,8,256], index: 4, kind: output, shape index: {}]  }
   0x1   :  { %2470 = sst [smem:[#allocation16_spill]] %s2458_s3 }
   0x2   :  { %2471 = sst [smem:[#allocation17_spill]] %s2459_s4 }
   0x3   :  { %9 = vsyncpa [#allocation3], 0 }
   0x4   :  { %11 = vsyncpa [#allocation3 + $0x1], 0 }
   0x5   :  { %12 = vsyncpa [#allocation6], 0 }
   0x6   :  { %13 = vsyncpa [#allocation4], 0 }
   0x7   :  { %15 = vsyncpa [#allocation4 + $0x1], 0  ;;  %s1805_s15 = smov 0   ;;  %s1807_s16 = smov 0  }
   0x8   :  { %s1809_s17 = smov 0   ;;  %s1811_s18 = smov 0  }
   0x9   :  { %s1813_s19 = smov 0   ;;  %s1815_s20 = smov 0  }
   0xa   :  { %s1817_s21 = smov 0   ;;  %s1819_s22 = smov 0  }
   0xb   :  { %s1821_s23 = smov 0   ;;  %s1823_s24 = smov 0  }
   0xc   :  { %s1825_s25 = smov 0  }
   0xd LB: > { %2472 = sst [smem:[#allocation11_spill]] %s1730_s15  ;;  %s1446_s26 = sadd.s32 4294967295, %s1770_s25   ;;  %s1770_s25 = sphi %s1825_s25, %s21_s25   ;;  %s1766_s24 = sphi %s1823_s24, %s2505_s24   ;;  %s1762_s23 = sphi %s1821_s23, %s2504_s23   ;;  %s1758_s22 = sphi %s1819_s22, %s2503_s22   ;;  %s1754_s21 = sphi %s1817_s21, %s2502_s21   ;;  %s1750_s20 = sphi %s1815_s20, %s2501_s20   ;;  %s1746_s19 = sphi %s1813_s19, %s2500_s19   ;;  %s1742_s18 = sphi %s1811_s18, %s2499_s18   ;;  %s1738_s17 = sphi %s1809_s17, %s2498_s17   ;;  %s1734_s16 = sphi %s1807_s16, %s2497_s16   ;;  %s1730_s15 = sphi %s1805_s15, %s2496_s15  }
   0xe   : > { %2473 = sst [smem:[#allocation12_spill]] %s1770_s25  ;;  %s1447_s27 = sadd.s32 4294967294, %s1770_s25  }
   0xf   : > { %s89_s28 = sadd.s32 1, %s1750_s20  ;;  %p96_p0 = scmp.ne.s32.totalorder %s1750_s20, %s1746_s19 }
  0x10   : > { %p97_p1 = scmp.eq.s32.totalorder %s1770_s25, 0  ;;  %p102_p2 = scmp.ne.s32.totalorder %s1746_s19, %s1742_s18 }
  0x11   : > { %p1865_p3 = scmp.eq.s32.totalorder %s1446_s26, 0  ;;  %p146_p5 = scmp.ne.s32.totalorder %s1738_s17, %s1734_s16 }
  0x12   : > { %p1870_p4 = por %p97_p1, %p96_p0  ;;  %p147_p7 = scmp.eq.s32.totalorder %s1446_s26, 15 }
  0x13   : > { %p1878_p6 = por %p1865_p3, %p102_p2  ;;  %p152_p8 = scmp.ne.s32.totalorder %s1734_s16, %s1730_s15 }
  0x14   : > { %p153_p9 = scmp.eq.s32.totalorder %s1447_s27, 15  ;;  %p1884_p10 = por %p147_p7, %p146_p5 }
  0x15   : > { %s2476_s6 = scalar_select %p1878_p6, 1, 0 }
  0x16   : > { %s2477_s7 = scalar_select %p1884_p10, 1, 0 }
  0x17   : > { %p1448_p11 = scmp.ge.s32.totalorder %s1770_s25, 1  ;;  %p1889_p12 = por %p153_p9, %p152_p8 }
  0x18   : > { %p160_p13 = scmp.lt.s32.totalorder %s1770_s25, 17  ;;  %s1772_s10 = smov [#allocation5]  }
  0x19   : > { %s2478_s8 = scalar_select %p1889_p12, 1, 0 }
  0x1a   : > { %p1894_p0 = pnand %p1448_p11, %p160_p13  ;;  %s176_s11 = sshll.u32 %s1772_s10, 4  ;;  %s177_s11 = int_to_ptr.vmem [resolvable:$true] %s176_s11 }
  0x1b   : > { %2479 = sst [smem:[#allocation13_spill]] %s2478_s8  ;;  %p1491_p2 = scmp.lt.s32.totalorder %s1770_s25, 16 }
  0x1c   : > { %s2480_s9 = scalar_select %p1894_p0, 1, 0 }
  0x1d   : > { %p1478_p1 = pneg %p1894_p0  ;;  %p1905_p7 = pnand %p1491_p2, %p1870_p4 }
  0x1e   : > { %s1603_s13 = scalar_lea.vmem %s177_s11, 32  ;;  %p1611_p12 = scmp.lt.s32.totalorder %s177_s11, %s177_s11 }
  0x1f   : > { %p1479_p5 = pnand %p1478_p1, %p1865_p3  ;;  %p1604_p9 = scmp.ne.s32.totalorder %s177_s11, %s1603_s13 }
  0x20   : > { %p1612_p10 = scmp.lt.s32.totalorder %s1603_s13, %s1603_s13 }
  0x21   : > { %p1594_p8 = pneg %p1479_p5 }
  0x22   : > { %p1613_p6 = por %p1612_p10, %p1611_p12 }
  0x23   : > { %p1606_p11 = pnand %p1604_p9, %p1594_p8 }
  0x25   : > { %p1607_p13 = pneg %p1606_p11 }
  0x27   : > { %p1614_p0 = pnand %p1613_p6, %p1607_p13 }
  0x29   : > { %1617 = shalt.err (!%p1614_p0)
}
  0x2a   : > { %s2482_s3 = sld [smem:[#allocation16_spill]]  ;;  %s30_s26 = sadd.s32 1, %s1762_s23 }
  0x2b   : > { %s33_s27 = sadd.s32 1, %s1766_s24  ;;  %p31_p4 = scmp.ge.s32.totalorder %s30_s26, 4 }
  0x2c   : > { %s200_s5 = sand.u32 1, %s1750_s20   ;;  %s1466_s14 = smul.u32 40960, %s1762_s23 }
  0x2d   : > { %s1467_s10 = smul.u32 2560, %s200_s5  ;;  %s2507_s26 = smov (%p31_p4, %s30_s26), 0 }
  0x2e   : > { %2483 = sst [smem:[#allocation14_spill]] %s2507_s26  ;;  %s2509_s27 = smov (!%p31_p4, %s33_s27), %s1766_s24 }
  0x2f   : > { %s86_s13 = ssub.s32 %s1762_s23, %s2507_s26  ;;  %p35_p6 = scmp.ge.s32.totalorder %s2509_s27, 4 }
  0x30   : > { %1481 = dma.hbm_to_vmem [thread:$0]  (!%p1479_p5), %s2482_s3, 32, %s177_s11, [#allocation6]  }
  0x31   : > { %p87_p10 = scmp.eq.s32.totalorder %s86_s13, 0  ;;  %s204_s18 = scalar_lea.vmem [#allocation2], %s1467_s10 }
  0x32   : > { %s212_s30 = sshll.u32 %s204_s18, 4  ;;  %s2511_s27 = smov (%p35_p6, %s2509_s27), 0  ;;  %s213_s30 = int_to_ptr.vmem [resolvable:$true] %s212_s30 }
  0x33   : > { %2484 = sst [smem:[#allocation15_spill]] %s2511_s27  ;;  %s133_s3 = ssub.s32 %s1766_s24, %s2511_s27 }
  0x34   : > { %s1926_s11 = scalar_select %p87_p10, %s1750_s20, %s89_s28  }
  0x35   : > { %s211_s25 = scalar_lea.hbm %s2457_s2, %s1466_s14  ;;  %p134_p12 = scmp.eq.s32.totalorder %s133_s3, 0 }
  0x36   : > { %s2485_s4 = sadd.s32 1, %s1738_s17  ;;  %s201_s13 = scalar_lea.sflag [#allocation3], %s200_s5 }
  0x37   : > { %s1936_s26 = scalar_select %p134_p12, %s1738_s17, %s2485_s4  }
  0x38   : > { %p1620_p0 = pneg %p1905_p7  ;;  %s1631_s10 = scalar_lea.vmem %s213_s30, 40960 }
  0x39   : > { %p1632_p1 = scmp.ne.s32.totalorder %s213_s30, %s1631_s10  ;;  %s1773_s18 = smov [#allocation2]  }
  0x3a   : > { %s1636_s28 = sshll.u32 %s1773_s18, 4  ;;  %s1637_s28 = int_to_ptr.vmem [resolvable:$false] %s1636_s28 }
  0x3b   : > { %p1634_p2 = pnand %p1632_p1, %p1620_p0  ;;  %s1638_s27 = scalar_lea.vmem %s1637_s28, 81920 }
  0x3c   : > { %p1639_p8 = scmp.lt.s32.totalorder %s213_s30, %s1637_s28  ;;  %p1640_p9 = scmp.lt.s32.totalorder %s1638_s27, %s1631_s10 }
  0x3d   : > { %p1635_p5 = pneg %p1634_p2 }
  0x3e   : > { %p1641_p11 = por %p1640_p9, %p1639_p8 }
  0x40   : > { %p1642_p13 = pnand %p1641_p11, %p1635_p5 }
  0x42   : > { %1645 = shalt.err (!%p1642_p13)
}
  0x43   : > { %s1774_s3 = smov 256   ;;  %s1775_s4 = smov 16  }
  0x44   : > { %1485 = dma.hbm_to_vmem [thread:$0]  (!%p1905_p7), %s211_s25, 40960, %s213_s30, %s201_s13, %s1774_s3, %s1774_s3, %s1775_s4  }
  0x45   : > { %p2486_p4 = scmp.ne.s32.totalorder %s2480_s9, 0 }
  0x46   : > { %s226_s15 = sand.u32 (!%p2486_p4), 1, %s1746_s19   ;;  %p2487_p6 = scmp.ne.s32.totalorder (!%p2486_p4), %s2476_s6, 0 }
  0x47   : > { %224 = sbr.rel (%p2486_p4) target bundleno = 579 (0x243), region = 36  ;;  %s227_s5 = scalar_lea.sflag (!%p2486_p4), [#allocation3], %s226_s15 }
  0x48   : > { %s1468_s8 = smul.u32 (!%p2486_p4), 2560, %s226_s15 }
  0x4a   : > { %s1945_s14 = scalar_lea.vmem (!%p2486_p4), [#allocation2], %s1468_s8 }
  0x4c   : > { %1717 = dma.done.wait (%p2487_p6), %s227_s5, 40960  }
  0x4d   : > { %1719 = vsyncadd (%p2487_p6), %s227_s5, 4294926336 }
  0x4e   : > { %1721 = dma.done.wait (%p1865_p3), [#allocation6], 32  }
  0x4f   : > { %1723 = vsyncadd (%p1865_p3), [#allocation6], 4294967264  ;;  %s265_s25 = sand.u32 1, %s1734_s16   ;;  %s268_s30 = smul.u32 10, %s1754_s21 }
  0x50   : > { %s1455_s9 = sshll.u32 %s265_s25, 4  ;;  %p269_p7 = scmp.lt.s32.totalorder %s1758_s22, 3 }
  0x51   : > { %p271_p10 = scmp.lt.s32.totalorder %s268_s30, 39  ;;  %s1966_s28 = scalar_lea.vmem [#allocation7], %s1455_s9 }
  0x52   : > { %s270_s12 = scalar_select %p269_p7, %s1758_s22, 3 }
  0x53   : > { %s2513_s30 = smov (!%p271_p10, %s268_s30), 39  ;;  %p1457_p3 = scmp.ne.s32.totalorder %s1754_s21, 0 }
  0x54   : > { %s1469_s6 = smul.u32 40, %s270_s12 }
  0x55   : > { %282 = sbr.rel (%p1457_p3) target bundleno = 99 (0x63), region = 48 }
  0x56   : > { %s274_s27 = sadd.s32 %s1469_s6, %s2513_s30 }
  0x57   : > { %s1456_s13 = sshll.u32 %s274_s27, 2 }
  0x58   : > { %s1964_s29 = scalar_lea.vmem %s2455_s0, %s1456_s13 }
  0x5a   : > { %v285_v0 = vlaneseq  ;;  %v283_v2 = vld [vmem:[#allocation5] sm:$0x3] }
  0x5c   : > { %v286_v1 = vshrl.u32 %v285_v0, 7 }
  0x5e   : > { %v287_v3 = vsub.s32 0, %v286_v1  ;;  %v291_v4 = vsub.s32 1, %v286_v1 }
  0x60   : > { %v288_v5 = vrot.slane %v283_v2, %v287_v3  ;;  %v292_v6 = vrot.slane %v283_v2, %v291_v4 }
  0x62   : > { %295 = vst [vmem:[%s1966_s28] sm:$0xff] %v288_v5  ;;  %296 = vst [vmem:[%s1966_s28 + $0x8] sm:$0xff] %v292_v6 }
  0x63 PF: > { %v302_v7 = vld [vmem:[%s2456_s1] sm:$0xff]  ;;  %v674_v8 = vld [vmem:[%s1945_s14 + $0xf8] sm:$0xff]  ;;  %v1776_v10 = vmov 0   ;;  %v1777_v11 = vmov 2   ;;  %v673_v12 = vld [vmem:[%s1945_s14 + $0xf0] sm:$0xff]  ;;  %v1778_v20 = vmov 1  }
  0x64   : > { %v738_v9 = vld [vmem:[%s1945_s14 + $0x2f8] sm:$0xff]  ;;  %1588 = vset.pattern.permute.xlu0 %v1776_v10  ;;  %1590 = vset.pattern.permute.xlu1 %v1777_v11  ;;  %v737_v13 = vld [vmem:[%s1945_s14 + $0x2f0] sm:$0xff]  ;;  %v672_v14 = vld [vmem:[%s1945_s14 + $0xe8] sm:$0xff]  ;;  %s1465_s21 = sshll.u32 %s1758_s22, 8  ;;  %s1337_s15 = sshll.u32 %s1966_s28, 4  ;;  %s1338_s15 = int_to_ptr.vmem [resolvable:$true] %s1337_s15 }
  0x65   : > { %305 = vperm.xlu0 %1588, %v302_v7   ;;  %528 = vperm.xlu1 %1590, %v302_v7   ;;  %v736_v15 = vld [vmem:[%s1945_s14 + $0x2e8] sm:$0xff]  ;;  %v671_v16 = vld [vmem:[%s1945_s14 + $0xe0] sm:$0xff]  ;;  %v670_v18 = vld [vmem:[%s1945_s14 + $0xd8] sm:$0xff]  ;;  %s1323_s9 = scalar_lea.sflag [#allocation4], %s265_s25  ;;  %s1646_s12 = scalar_lea.vmem %s1338_s15, 256 }
  0x66   : > { %963 = vmatprep.subr.mxu0 %v674_v8  ;;  %1034 = vmatprep.subr.mxu1 %v738_v9  ;;  %v735_v17 = vld [vmem:[%s1945_s14 + $0x2e0] sm:$0xff]  ;;  %v734_v19 = vld [vmem:[%s1945_s14 + $0x2d8] sm:$0xff]  ;;  %v669_v21 = vld [vmem:[%s1945_s14 + $0xd0] sm:$0xff]  ;;  %p1647_p12 = scmp.ne.s32.totalorder %s1338_s15, %s1646_s12  ;;  %p2489_p0 = scmp.ne.s32.totalorder %s2477_s7, 0 }
  0x67   : > { %964 = vmatpush1.msra.mxu0 %v673_v12  ;;  %1035 = vmatpush1.msra.mxu1 %v737_v13  ;;  %v733_v22 = vld [vmem:[%s1945_s14 + $0x2d0] sm:$0xff]  ;;  %v668_v23 = vld [vmem:[%s1945_s14 + $0xc8] sm:$0xff]  ;;  %v667_v25 = vld [vmem:[%s1945_s14 + $0xc0] sm:$0xff]  ;;  %s1779_s6 = smov [#allocation7]  }
  0x68   : > { %965 = vmatprep.subr.mxu0 %v672_v14  ;;  %1036 = vmatprep.subr.mxu1 %v736_v15  ;;  %v732_v24 = vld [vmem:[%s1945_s14 + $0x2c8] sm:$0xff]  ;;  %v731_v26 = vld [vmem:[%s1945_s14 + $0x2c0] sm:$0xff]  ;;  %v666_v27 = vld [vmem:[%s1945_s14 + $0xb8] sm:$0xff]  ;;  %p1648_p1 = pnand %p1647_p12, %p2489_p0  ;;  %s1650_s22 = sshll.u32 %s1779_s6, 4  ;;  %s1651_s22 = int_to_ptr.vmem [resolvable:$false] %s1650_s22 }
  0x69   : > { %1589 = vset.pattern.permute.xlu0 %v1778_v20  ;;  %966 = vmatpush1.msra.mxu0 %v671_v16  ;;  %v730_v28 = vld [vmem:[%s1945_s14 + $0x2b8] sm:$0xff]  ;;  %v665_v29 = vld [vmem:[%s1945_s14 + $0xb0] sm:$0xff]  ;;  %v664_v31 = vld [vmem:[%s1945_s14 + $0xa8] sm:$0xff]  ;;  %s1652_s27 = scalar_lea.vmem %s1651_s22, 512  ;;  %p1653_p5 = scmp.lt.s32.totalorder %s1338_s15, %s1651_s22 }
  0x6a   : > { %414 = vperm.xlu0 %1589, %v302_v7   ;;  %1037 = vmatpush1.msra.mxu1 %v735_v17  ;;  %v729_v30 = vld [vmem:[%s1945_s14 + $0x2b0] sm:$0xff]  ;;  %v728_v32 = vld [vmem:[%s1945_s14 + $0x2a8] sm:$0xff]  ;;  %v663_v33 = vld [vmem:[%s1945_s14 + $0xa0] sm:$0xff]  ;;  %p1649_p2 = pneg %p1648_p1  ;;  %p1654_p8 = scmp.lt.s32.totalorder %s1652_s27, %s1646_s12 }
  0x6b   : > { %967 = vmatprep.subr.mxu0 %v670_v18  ;;  %1038 = vmatprep.subr.mxu1 %v734_v19  ;;  %v727_v34 = vld [vmem:[%s1945_s14 + $0x2a0] sm:$0xff]  ;;  %v662_v35 = vld [vmem:[%s1945_s14 + $0x98] sm:$0xff]  ;;  %v661_v37 = vld [vmem:[%s1945_s14 + $0x90] sm:$0xff] }
  0x6c   : > { %968 = vmatpush1.msra.mxu0 %v669_v21  ;;  %1039 = vmatpush1.msra.mxu1 %v733_v22  ;;  %v726_v36 = vld [vmem:[%s1945_s14 + $0x298] sm:$0xff]  ;;  %v725_v38 = vld [vmem:[%s1945_s14 + $0x290] sm:$0xff]  ;;  %v660_v39 = vld [vmem:[%s1945_s14 + $0x88] sm:$0xff]  ;;  %p1655_p9 = por %p1654_p8, %p1653_p5 }
  0x6d   : > { %969 = vmatprep.subr.mxu0 %v668_v23  ;;  %1040 = vmatprep.subr.mxu1 %v732_v24  ;;  %v724_v40 = vld [vmem:[%s1945_s14 + $0x288] sm:$0xff]  ;;  %v659_v41 = vld [vmem:[%s1945_s14 + $0x80] sm:$0xff]  ;;  %v658_v43 = vld [vmem:[%s1945_s14 + $0x78] sm:$0xff] }
  0x6e   : > { %970 = vmatpush1.msra.mxu0 %v667_v25  ;;  %1041 = vmatpush1.msra.mxu1 %v731_v26  ;;  %v723_v42 = vld [vmem:[%s1945_s14 + $0x280] sm:$0xff]  ;;  %v722_v44 = vld [vmem:[%s1945_s14 + $0x278] sm:$0xff]  ;;  %v657_v45 = vld [vmem:[%s1945_s14 + $0x70] sm:$0xff]  ;;  %p1656_p11 = pnand %p1655_p9, %p1649_p2 }
  0x6f   : > { %971 = vmatprep.subr.mxu0 %v666_v27  ;;  %1042 = vmatprep.subr.mxu1 %v730_v28  ;;  %v721_v46 = vld [vmem:[%s1945_s14 + $0x270] sm:$0xff]  ;;  %v656_v47 = vld [vmem:[%s1945_s14 + $0x68] sm:$0xff]  ;;  %v655_v49 = vld [vmem:[%s1945_s14 + $0x60] sm:$0xff] }
  0x70   : > { %972 = vmatpush1.msra.mxu0 %v665_v29  ;;  %1043 = vmatpush1.msra.mxu1 %v729_v30  ;;  %v720_v48 = vld [vmem:[%s1945_s14 + $0x268] sm:$0xff]  ;;  %v719_v50 = vld [vmem:[%s1945_s14 + $0x260] sm:$0xff]  ;;  %v654_v51 = vld [vmem:[%s1945_s14 + $0x58] sm:$0xff] }
  0x71   : > { %973 = vmatprep.subr.mxu0 %v664_v31  ;;  %1044 = vmatprep.subr.mxu1 %v728_v32  ;;  %v718_v52 = vld [vmem:[%s1945_s14 + $0x258] sm:$0xff]  ;;  %v653_v53 = vld [vmem:[%s1945_s14 + $0x50] sm:$0xff]  ;;  %v652_v55 = vld [vmem:[%s1945_s14 + $0x48] sm:$0xff] }
  0x72   : > { %974 = vmatpush1.msra.mxu0 %v663_v33  ;;  %1045 = vmatpush1.msra.mxu1 %v727_v34  ;;  %v717_v54 = vld [vmem:[%s1945_s14 + $0x250] sm:$0xff]  ;;  %v716_v56 = vld [vmem:[%s1945_s14 + $0x248] sm:$0xff]  ;;  %v651_v57 = vld [vmem:[%s1945_s14 + $0x40] sm:$0xff] }
  0x73   : > { %975 = vmatprep.subr.mxu0 %v662_v35  ;;  %1046 = vmatprep.subr.mxu1 %v726_v36  ;;  %v715_v58 = vld [vmem:[%s1945_s14 + $0x240] sm:$0xff]  ;;  %v650_v59 = vld [vmem:[%s1945_s14 + $0x38] sm:$0xff]  ;;  %v649_v61 = vld [vmem:[%s1945_s14 + $0x30] sm:$0xff] }
  0x74   : > { %976 = vmatpush1.msra.mxu0 %v661_v37  ;;  %1047 = vmatpush1.msra.mxu1 %v725_v38  ;;  %v714_v60 = vld [vmem:[%s1945_s14 + $0x238] sm:$0xff]  ;;  %v713_v62 = vld [vmem:[%s1945_s14 + $0x230] sm:$0xff]  ;;  %v648_v63 = vld [vmem:[%s1945_s14 + $0x28] sm:$0xff] }
  0x75   : > { %977 = vmatprep.subr.mxu0 %v660_v39  ;;  %1048 = vmatprep.subr.mxu1 %v724_v40  ;;  %v712_v0 = vld [vmem:[%s1945_s14 + $0x228] sm:$0xff]  ;;  %v647_v1 = vld [vmem:[%s1945_s14 + $0x20] sm:$0xff]  ;;  %v646_v3 = vld [vmem:[%s1945_s14 + $0x18] sm:$0xff]  ;;  %v313_v40 = vlaneseq }
  0x76   : > { %978 = vmatpush1.msra.mxu0 %v659_v41  ;;  %1049 = vmatpush1.msra.mxu1 %v723_v42  ;;  %v711_v2 = vld [vmem:[%s1945_s14 + $0x220] sm:$0xff]  ;;  %v710_v4 = vld [vmem:[%s1945_s14 + $0x218] sm:$0xff]  ;;  %v645_v5 = vld [vmem:[%s1945_s14 + $0x10] sm:$0xff] }
  0x77   : > { %979 = vmatprep.subr.mxu0 %v658_v43  ;;  %1050 = vmatprep.subr.mxu1 %v722_v44  ;;  %v709_v6 = vld [vmem:[%s1945_s14 + $0x210] sm:$0xff]  ;;  %v644_v7 = vld [vmem:[%s1945_s14 + $0x8] sm:$0xff]  ;;  %v643_v9 = vld [vmem:[%s1945_s14] sm:$0xff] }
  0x78   : > { %980 = vmatpush1.msra.mxu0 %v657_v45  ;;  %1051 = vmatpush1.msra.mxu1 %v721_v46  ;;  %v708_v8 = vld [vmem:[%s1945_s14 + $0x208] sm:$0xff]  ;;  %v707_v10 = vld [vmem:[%s1945_s14 + $0x200] sm:$0xff]  ;;  %v706_v12 = vld [vmem:[%s1945_s14 + $0x1f8] sm:$0xff] }
  0x79   : > { %981 = vmatprep.subr.mxu0 %v656_v47  ;;  %1052 = vmatprep.subr.mxu1 %v720_v48  ;;  %v770_v13 = vld [vmem:[%s1945_s14 + $0x3f8] sm:$0xff]  ;;  %v705_v14 = vld [vmem:[%s1945_s14 + $0x1f0] sm:$0xff]  ;;  %v704_v16 = vld [vmem:[%s1945_s14 + $0x1e8] sm:$0xff] }
  0x7a   : > { %982 = vmatpush1.msra.mxu0 %v655_v49  ;;  %1053 = vmatpush1.msra.mxu1 %v719_v50  ;;  %v769_v15 = vld [vmem:[%s1945_s14 + $0x3f0] sm:$0xff]  ;;  %v768_v17 = vld [vmem:[%s1945_s14 + $0x3e8] sm:$0xff]  ;;  %v703_v18 = vld [vmem:[%s1945_s14 + $0x1e0] sm:$0xff]  ;;  %v2075_v49 = vshrl.u32 %v313_v40, 7 }
  0x7b   : > { %983 = vmatprep.subr.mxu0 %v654_v51  ;;  %1054 = vmatprep.subr.mxu1 %v718_v52  ;;  %v767_v19 = vld [vmem:[%s1945_s14 + $0x3e0] sm:$0xff]  ;;  %v702_v20 = vld [vmem:[%s1945_s14 + $0x1d8] sm:$0xff]  ;;  %v701_v22 = vld [vmem:[%s1945_s14 + $0x1d0] sm:$0xff] }
  0x7c   : > { %984 = vmatpush1.msra.mxu0 %v653_v53  ;;  %1055 = vmatpush1.msra.mxu1 %v717_v54  ;;  %v766_v21 = vld [vmem:[%s1945_s14 + $0x3d8] sm:$0xff]  ;;  %v765_v23 = vld [vmem:[%s1945_s14 + $0x3d0] sm:$0xff]  ;;  %v700_v24 = vld [vmem:[%s1945_s14 + $0x1c8] sm:$0xff]  ;;  %v2082_v54 = vsub.s32 2, %v2075_v49 }
  0x7d   : > { %985 = vmatprep.subr.mxu0 %v652_v55  ;;  %1056 = vmatprep.subr.mxu1 %v716_v56  ;;  %v764_v25 = vld [vmem:[%s1945_s14 + $0x3c8] sm:$0xff]  ;;  %v699_v26 = vld [vmem:[%s1945_s14 + $0x1c0] sm:$0xff]  ;;  %v698_v28 = vld [vmem:[%s1945_s14 + $0x1b8] sm:$0xff] }
  0x7e   : > { %986 = vmatpush1.msra.mxu0 %v651_v57  ;;  %1057 = vmatpush1.msra.mxu1 %v715_v58  ;;  %v763_v27 = vld [vmem:[%s1945_s14 + $0x3c0] sm:$0xff]  ;;  %v762_v29 = vld [vmem:[%s1945_s14 + $0x3b8] sm:$0xff]  ;;  %v697_v30 = vld [vmem:[%s1945_s14 + $0x1b0] sm:$0xff] }
  0x7f   : > { %987 = vmatprep.subr.mxu0 %v650_v59  ;;  %1058 = vmatprep.subr.mxu1 %v714_v60  ;;  %v761_v31 = vld [vmem:[%s1945_s14 + $0x3b0] sm:$0xff]  ;;  %v696_v32 = vld [vmem:[%s1945_s14 + $0x1a8] sm:$0xff]  ;;  %v695_v34 = vld [vmem:[%s1945_s14 + $0x1a0] sm:$0xff] }
  0x80   : > { %988 = vmatpush1.msra.mxu0 %v649_v61  ;;  %1059 = vmatpush1.msra.mxu1 %v713_v62  ;;  %v760_v33 = vld [vmem:[%s1945_s14 + $0x3a8] sm:$0xff]  ;;  %v759_v35 = vld [vmem:[%s1945_s14 + $0x3a0] sm:$0xff]  ;;  %v694_v36 = vld [vmem:[%s1945_s14 + $0x198] sm:$0xff] }
  0x81   : > { %989 = vmatprep.subr.mxu0 %v648_v63  ;;  %1060 = vmatprep.subr.mxu1 %v712_v0  ;;  %v758_v37 = vld [vmem:[%s1945_s14 + $0x398] sm:$0xff]  ;;  %v693_v38 = vld [vmem:[%s1945_s14 + $0x190] sm:$0xff]  ;;  %v692_v41 = vld [vmem:[%s1945_s14 + $0x188] sm:$0xff] }
  0x82   : > { %990 = vmatpush1.msra.mxu0 %v647_v1  ;;  %1061 = vmatpush1.msra.mxu1 %v711_v2  ;;  %v757_v39 = vld [vmem:[%s1945_s14 + $0x390] sm:$0xff]  ;;  %v756_v42 = vld [vmem:[%s1945_s14 + $0x388] sm:$0xff]  ;;  %v691_v43 = vld [vmem:[%s1945_s14 + $0x180] sm:$0xff] }
  0x83   : > { %991 = vmatprep.subr.mxu0 %v646_v3  ;;  %1062 = vmatprep.subr.mxu1 %v710_v4  ;;  %v755_v44 = vld [vmem:[%s1945_s14 + $0x380] sm:$0xff]  ;;  %v690_v45 = vld [vmem:[%s1945_s14 + $0x178] sm:$0xff]  ;;  %v689_v47 = vld [vmem:[%s1945_s14 + $0x170] sm:$0xff] }
  0x84   : > { %992 = vmatpush1.msra.mxu0 %v645_v5  ;;  %1063 = vmatpush1.msra.mxu1 %v709_v6  ;;  %v754_v46 = vld [vmem:[%s1945_s14 + $0x378] sm:$0xff]  ;;  %v753_v48 = vld [vmem:[%s1945_s14 + $0x370] sm:$0xff]  ;;  %v688_v50 = vld [vmem:[%s1945_s14 + $0x168] sm:$0xff] }
  0x85   : > { %993 = vmatprep.subr.mxu0 %v644_v7  ;;  %1064 = vmatprep.subr.mxu1 %v708_v8  ;;  %v752_v51 = vld [vmem:[%s1945_s14 + $0x368] sm:$0xff]  ;;  %v687_v52 = vld [vmem:[%s1945_s14 + $0x160] sm:$0xff]  ;;  %v686_v55 = vld [vmem:[%s1945_s14 + $0x158] sm:$0xff] }
  0x86   : > { %994 = vmatpush1.msra.mxu0 %v643_v9  ;;  %1065 = vmatpush1.msra.mxu1 %v707_v10  ;;  %v751_v53 = vld [vmem:[%s1945_s14 + $0x360] sm:$0xff]  ;;  %v750_v56 = vld [vmem:[%s1945_s14 + $0x358] sm:$0xff]  ;;  %v685_v57 = vld [vmem:[%s1945_s14 + $0x150] sm:$0xff] }
  0x87   : > { %995 = vmatprep.subr.mxu0 %v706_v12  ;;  %1066 = vmatprep.subr.mxu1 %v770_v13  ;;  %v749_v58 = vld [vmem:[%s1945_s14 + $0x350] sm:$0xff]  ;;  %v684_v59 = vld [vmem:[%s1945_s14 + $0x148] sm:$0xff]  ;;  %v683_v62 = vld [vmem:[%s1945_s14 + $0x140] sm:$0xff] }
  0x88   : > { %996 = vmatpush2.msra.mxu0 %v705_v14  ;;  %1067 = vmatpush2.msra.mxu1 %v769_v15  ;;  %v748_v60 = vld [vmem:[%s1945_s14 + $0x348] sm:$0xff]  ;;  %v2091_v61 = vld [vmem:[%s1964_s29 + $0x10] sm:$0x77]  ;;  %v747_v63 = vld [vmem:[%s1945_s14 + $0x340] sm:$0xff] }
  0x89   : > { %997 = vmatprep.subr.mxu0 %v704_v16  ;;  %1068 = vmatprep.subr.mxu1 %v768_v17  ;;  %v2096_v0 = vld [vmem:[%s1964_s29 + $0x18] sm:$0x77]  ;;  %v550_v1 = vrot.slane %v2091_v61, %v2082_v54  ;;  %v681_v5 = vld [vmem:[%s1945_s14 + $0x130] sm:$0xff]  ;;  %v680_v8 = vld [vmem:[%s1945_s14 + $0x128] sm:$0xff] }
  0x8a   : > { %998 = vmatpush2.msra.mxu0 %v703_v18  ;;  %1069 = vmatpush2.msra.mxu1 %v767_v19  ;;  %v682_v2 = vld [vmem:[%s1945_s14 + $0x138] sm:$0xff]  ;;  %v558_v4 = vrot.slane %v2096_v0, %v2082_v54  ;;  %v745_v6 = vld [vmem:[%s1945_s14 + $0x330] sm:$0xff]  ;;  %v744_v9 = vld [vmem:[%s1945_s14 + $0x328] sm:$0xff] }
  0x8b   : > { %999 = vmatprep.subr.mxu0 %v702_v20  ;;  %1070 = vmatprep.subr.mxu1 %v766_v21  ;;  %v746_v3 = vld [vmem:[%s1945_s14 + $0x338] sm:$0xff]  ;;  %v2107_v7 = vrot.slane %v550_v1, %v2082_v54  ;;  %v679_v12 = vld [vmem:[%s1945_s14 + $0x120] sm:$0xff]  ;;  %v677_v16 = vld [vmem:[%s1945_s14 + $0x110] sm:$0xff] }
  0x8c   : > { %1000 = vmatpush2.msra.mxu0 %v701_v22  ;;  %1071 = vmatpush2.msra.mxu1 %v765_v23  ;;  %v2112_v10 = vrot.slane %v558_v4, %v2082_v54  ;;  %v743_v13 = vld [vmem:[%s1945_s14 + $0x320] sm:$0xff]  ;;  %v678_v14 = vld [vmem:[%s1945_s14 + $0x118] sm:$0xff]  ;;  %v741_v17 = vld [vmem:[%s1945_s14 + $0x310] sm:$0xff] }
  0x8d   : > { %1001 = vmatprep.subr.mxu0 %v700_v24  ;;  %1072 = vmatprep.subr.mxu1 %v764_v25  ;;  %v742_v15 = vld [vmem:[%s1945_s14 + $0x318] sm:$0xff]  ;;  %v676_v18 = vld [vmem:[%s1945_s14 + $0x108] sm:$0xff]  ;;  %v675_v20 = vld [vmem:[%s1945_s14 + $0x100] sm:$0xff]  ;;  %v2128_v24 = vsub.s32 0, %v2075_v49  ;;  %v319_v25 = vsub.s32 4, %v2075_v49 }
  0x8e   : > { %1002 = vmatpush2.msra.mxu0 %v699_v26  ;;  %1073 = vmatpush2.msra.mxu1 %v763_v27  ;;  %v740_v19 = vld [vmem:[%s1945_s14 + $0x308] sm:$0xff]  ;;  %v739_v21 = vld [vmem:[%s1945_s14 + $0x300] sm:$0xff]  ;;  %v802_v22 = vld [vmem:[%s1945_s14 + $0x4f8] sm:$0xff]  ;;  %v423_v26 = vsub.s32 5, %v2075_v49  ;;  %v537_v27 = vsub.s32 6, %v2075_v49 }
  0x8f   : > { %1003 = vmatprep.subr.mxu0 %v698_v28  ;;  %1074 = vmatprep.subr.mxu1 %v762_v29  ;;  %v866_v23 = vld [vmem:[%s1945_s14 + $0x6f8] sm:$0xff]  ;;  %v419_v28 = vsub.s32 1, %v2075_v49  ;;  %v301_v29 = vld [vmem:[%s1964_s29 + $0x20] sm:$0x77] }
  0x90   : > { %1004 = vmatpush2.msra.mxu0 %v697_v30  ;;  %1075 = vmatpush2.msra.mxu1 %v761_v31  ;;  %v352_v30 = vrot.slane %v301_v29, %v319_v25  ;;  %v456_v31 = vrot.slane %v301_v29, %v423_v26  ;;  %v440_v1 = vrot.slane %v2091_v61, %v423_v26 }
  0x91   : > { %1005 = vmatprep.subr.mxu0 %v696_v32  ;;  %1076 = vmatprep.subr.mxu1 %v760_v33  ;;  %v570_v32 = vrot.slane %v301_v29, %v537_v27  ;;  %v348_v33 = vrot.slane %v301_v29, %v2128_v24  ;;  %v448_v4 = vrot.slane %v2096_v0, %v423_v26 }
  0x92   : > { %1006 = vmatpush2.msra.mxu0 %v695_v34  ;;  %1077 = vmatpush2.msra.mxu1 %v759_v35  ;;  %v566_v34 = vrot.slane %v301_v29, %v2082_v54  ;;  %v2138_v35 = vrot.slane %v352_v30, %v2128_v24 }
  0x93   : > { %1007 = vmatprep.subr.mxu0 %v694_v36  ;;  %1078 = vmatprep.subr.mxu1 %v758_v37  ;;  %v2140_v36 = vrot.slane %v456_v31, %v419_v28  ;;  %v2143_v37 = vrot.slane %v570_v32, %v2082_v54 }
  0x94   : > { %1008 = vmatpush2.msra.mxu0 %v693_v38  ;;  %1079 = vmatpush2.msra.mxu1 %v757_v39  ;;  %v2146_v38 = vrot.slane %v348_v33, %v2128_v24  ;;  %v2151_v40 = vrot.slane %v566_v34, %v2082_v54 }
  0x95   : > { %1009 = vmatprep.subr.mxu0 %v692_v41  ;;  %1080 = vmatprep.subr.mxu1 %v756_v42  ;;  %v297_v41 = vld [vmem:[%s1964_s29] sm:$0x77]  ;;  %v298_v42 = vld [vmem:[%s1964_s29 + $0x8] sm:$0x77] }
  0x96   : > { %1010 = vmatpush2.msra.mxu0 %v691_v43  ;;  %1081 = vmatpush2.msra.mxu1 %v755_v44  ;;  %v320_v43 = vrot.slane %v297_v41, %v319_v25  ;;  %v424_v44 = vrot.slane %v297_v41, %v423_v26 }
  0x97   : > { %1011 = vmatprep.subr.mxu0 %v690_v45  ;;  %1082 = vmatprep.subr.mxu1 %v754_v46  ;;  %v538_v45 = vrot.slane %v297_v41, %v537_v27  ;;  %v328_v46 = vrot.slane %v298_v42, %v319_v25 }
  0x98   : > { %1012 = vmatpush2.msra.mxu0 %v689_v47  ;;  %1083 = vmatpush2.msra.mxu1 %v753_v48  ;;  %v432_v47 = vrot.slane %v298_v42, %v423_v26  ;;  %v546_v48 = vrot.slane %v298_v42, %v537_v27  ;;  %v370_v49 = vrot.slane %v320_v43, %v2128_v24 }
  0x99   : > { %1013 = vmatprep.subr.mxu0 %v688_v50  ;;  %1084 = vmatprep.subr.mxu1 %v752_v51  ;;  %v474_v50 = vrot.slane %v424_v44, %v419_v28  ;;  %v588_v51 = vrot.slane %v538_v45, %v2082_v54 }
  0x9a   : > { %1014 = vmatpush2.msra.mxu0 %v687_v52  ;;  %1085 = vmatpush2.msra.mxu1 %v751_v53  ;;  %v378_v52 = vrot.slane %v328_v46, %v2128_v24  ;;  %v482_v53 = vrot.slane %v432_v47, %v419_v28 }
  0x9b   : > { %1015 = vmatprep.subr.mxu0 %v686_v55  ;;  %1086 = vmatprep.subr.mxu1 %v750_v56  ;;  %v596_v55 = vrot.slane %v546_v48, %v2082_v54  ;;  %v316_v56 = vrot.slane %v297_v41, %v2128_v24 }
  0x9c   : > { %1016 = vmatpush2.msra.mxu0 %v685_v57  ;;  %1087 = vmatpush2.msra.mxu1 %v749_v58  ;;  %v420_v57 = vrot.slane %v297_v41, %v419_v28  ;;  %v534_v58 = vrot.slane %v297_v41, %v2082_v54 }
  0x9d   : > { %1017 = vmatprep.subr.mxu0 %v684_v59  ;;  %1088 = vmatprep.subr.mxu1 %v748_v60  ;;  %v324_v59 = vrot.slane %v298_v42, %v2128_v24  ;;  %v428_v60 = vrot.slane %v298_v42, %v419_v28 }
  0x9e   : > { %1018 = vmatpush2.msra.mxu0 %v683_v62  ;;  %1089 = vmatpush2.msra.mxu1 %v747_v63  ;;  %v542_v62 = vrot.slane %v298_v42, %v2082_v54  ;;  %v336_v63 = vrot.slane %v2091_v61, %v319_v25 }
  0x9f   : > { %1019 = vmatprep.subr.mxu0 %v682_v2  ;;  %1090 = vmatprep.subr.mxu1 %v746_v3  ;;  %v554_v2 = vrot.slane %v2091_v61, %v537_v27  ;;  %v344_v3 = vrot.slane %v2096_v0, %v319_v25 }
  0xa0   : > { %1020 = vmatpush2.msra.mxu0 %v681_v5  ;;  %1091 = vmatpush2.msra.mxu1 %v745_v6  ;;  %v562_v5 = vrot.slane %v2096_v0, %v537_v27  ;;  %v332_v6 = vrot.slane %v2091_v61, %v2128_v24 }
  0xa1   : > { %1021 = vmatprep.subr.mxu0 %v680_v8  ;;  %1092 = vmatprep.subr.mxu1 %v744_v9  ;;  %v436_v8 = vrot.slane %v2091_v61, %v419_v28  ;;  %v340_v9 = vrot.slane %v2096_v0, %v2128_v24  ;;  %v604_v61 = vrot.slane %v554_v2, %v2082_v54 }
  0xa2   : > { %1022 = vmatpush2.msra.mxu0 %v679_v12  ;;  %1093 = vmatpush2.msra.mxu1 %v743_v13  ;;  %v444_v12 = vrot.slane %v2096_v0, %v419_v28  ;;  %v366_v13 = vrot.slane %v316_v56, %v2128_v24  ;;  %v612_v0 = vrot.slane %v562_v5, %v2082_v54 }
  0xa3   : > { %1023 = vmatprep.subr.mxu0 %v678_v14  ;;  %1094 = vmatprep.subr.mxu1 %v742_v15  ;;  %v470_v14 = vrot.slane %v420_v57, %v419_v28  ;;  %v584_v15 = vrot.slane %v534_v58, %v2082_v54  ;;  %v382_v26 = vrot.slane %v332_v6, %v2128_v24 }
  0xa4   : > { %1024 = vmatpush2.msra.mxu0 %v677_v16  ;;  %1095 = vmatpush2.msra.mxu1 %v741_v17  ;;  %v374_v16 = vrot.slane %v324_v59, %v2128_v24  ;;  %v478_v17 = vrot.slane %v428_v60, %v419_v28  ;;  %v486_v27 = vrot.slane %v436_v8, %v419_v28  ;;  %v801_v8 = vld [vmem:[%s1945_s14 + $0x4f0] sm:$0xff] }
  0xa5   : > { %1025 = vmatprep.subr.mxu0 %v676_v18  ;;  %1096 = vmatprep.subr.mxu1 %v740_v19  ;;  %v592_v18 = vrot.slane %v542_v62, %v2082_v54  ;;  %v386_v19 = vrot.slane %v336_v63, %v2128_v24  ;;  %v494_v30 = vrot.slane %v444_v12, %v419_v28 }
  0xa6   : > { %1026 = vmatpush2.msra.mxu0 %v675_v20  ;;  %1097 = vmatpush2.msra.mxu1 %v739_v21  ;;  %v490_v20 = vrot.slane %v440_v1, %v419_v28  ;;  %v394_v21 = vrot.slane %v344_v3, %v2128_v24 }
  0xa7   : > { %1105 = vmatprep.subr.mxu0 %v802_v22  ;;  %1176 = vmatprep.subr.mxu1 %v866_v23  ;;  %v498_v22 = vrot.slane %v448_v4, %v419_v28 }
  0xa8   : > { %1591 = vset.pattern.permute.xlu0 %v1777_v11  ;;  %v452_v11 = vrot.slane %v301_v29, %v419_v28  ;;  %v390_v29 = vrot.slane %v340_v9, %v2128_v24  ;;  %v865_v9 = vld [vmem:[%s1945_s14 + $0x6f0] sm:$0xff] }
  0xaa   : > { %v2148_v39 = vrot.slane %v452_v11, %v419_v28 }
  0xe0   : > { %v306_v23 = vpop.permute.xlu0 %305  ;;  %v529_v25 = vpop.permute.xlu1 %528 }
  0xe1   : > { %v404_v31 = vmul.f32 %v370_v49, %v306_v23  ;;  %v622_v32 = vmul.f32 %v588_v51, %v529_v25  ;;  %v406_v33 = vmul.f32 %v378_v52, %v306_v23  ;;  %v624_v11 = vmul.f32 %v596_v55, %v529_v25 }
  0xe2   : > { %v403_v34 = vmul.f32 %v366_v13, %v306_v23  ;;  %v621_v41 = vmul.f32 %v584_v15, %v529_v25  ;;  %v405_v42 = vmul.f32 %v374_v16, %v306_v23  ;;  %v623_v43 = vmul.f32 %v592_v18, %v529_v25  ;;  %v864_v18 = vld [vmem:[%s1945_s14 + $0x6e8] sm:$0xff] }
  0xe3   : > { %v408_v44 = vmul.f32 %v386_v19, %v306_v23  ;;  %v626_v45 = vmul.f32 %v604_v61, %v529_v25  ;;  %v410_v46 = vmul.f32 %v394_v21, %v306_v23  ;;  %v628_v54 = vmul.f32 %v612_v0, %v529_v25  ;;  %v863_v61 = vld [vmem:[%s1945_s14 + $0x6e0] sm:$0xff]  ;;  %v797_v0 = vld [vmem:[%s1945_s14 + $0x4d0] sm:$0xff] }
  0xe4   : > { %v407_v47 = vmul.f32 %v382_v26, %v306_v23  ;;  %v625_v48 = vmul.f32 %v2107_v7, %v529_v25  ;;  %v409_v56 = vmul.f32 %v390_v29, %v306_v23  ;;  %v627_v57 = vmul.f32 %v2112_v10, %v529_v25  ;;  %v860_v29 = vld [vmem:[%s1945_s14 + $0x6c8] sm:$0xff] }
  0xe5   : > { %v415_v24 = vpop.permute.xlu0 %414  ;;  %v412_v28 = vmul.f32 %v2138_v35, %v306_v23  ;;  %v630_v49 = vmul.f32 %v2143_v37, %v529_v25  ;;  %v411_v51 = vmul.f32 %v2146_v38, %v306_v23  ;;  %v629_v52 = vmul.f32 %v2151_v40, %v529_v25  ;;  %v861_v23 = vld [vmem:[%s1945_s14 + $0x6d0] sm:$0xff] }
  0xe6   : > { %v508_v55 = vmul.f32 %v474_v50, %v415_v24  ;;  %v510_v58 = vmul.f32 %v482_v53, %v415_v24  ;;  %v507_v59 = vmul.f32 %v470_v14, %v415_v24  ;;  %v509_v60 = vmul.f32 %v478_v17, %v415_v24  ;;  %v800_v14 = vld [vmem:[%s1945_s14 + $0x4e8] sm:$0xff] }
  0xe7   : > { %v512_v62 = vmul.f32 %v490_v20, %v415_v24  ;;  %v514_v63 = vmul.f32 %v498_v22, %v415_v24  ;;  %v511_v7 = vmul.f32 %v486_v27, %v415_v24  ;;  %v513_v1 = vmul.f32 %v494_v30, %v415_v24  ;;  %v799_v20 = vld [vmem:[%s1945_s14 + $0x4e0] sm:$0xff]  ;;  %v796_v27 = vld [vmem:[%s1945_s14 + $0x4c8] sm:$0xff] }
  0xe8   : > { %v518_v10 = vadd.f32 %v508_v55, %v404_v31  ;;  %v520_v2 = vadd.f32 %v510_v58, %v406_v33  ;;  %v517_v3 = vadd.f32 %v507_v59, %v403_v34  ;;  %v519_v35 = vadd.f32 %v509_v60, %v405_v42  ;;  %v795_v30 = vld [vmem:[%s1945_s14 + $0x4c0] sm:$0xff]  ;;  %v858_v33 = vld [vmem:[%s1945_s14 + $0x6b8] sm:$0xff]  ;;  %v857_v34 = vld [vmem:[%s1945_s14 + $0x6b0] sm:$0xff] }
  0xe9   : > { %v522_v37 = vadd.f32 %v512_v62, %v408_v44  ;;  %v524_v4 = vadd.f32 %v514_v63, %v410_v46  ;;  %v521_v38 = vadd.f32 %v511_v7, %v407_v47  ;;  %v523_v5 = vadd.f32 %v513_v1, %v409_v56  ;;  %v859_v31 = vld [vmem:[%s1945_s14 + $0x6c0] sm:$0xff]  ;;  %v856_v42 = vld [vmem:[%s1945_s14 + $0x6a8] sm:$0xff]  ;;  %v854_v46 = vld [vmem:[%s1945_s14 + $0x698] sm:$0xff] }
  0xea   : > { %v632_v40 = vadd.f32 %v622_v32, %v518_v10  ;;  %v634_v50 = vadd.f32 %v624_v11, %v520_v2  ;;  %v631_v53 = vadd.f32 %v621_v41, %v517_v3  ;;  %v633_v6 = vadd.f32 %v623_v43, %v519_v35  ;;  %v794_v32 = vld [vmem:[%s1945_s14 + $0x4b8] sm:$0xff]  ;;  %v793_v11 = vld [vmem:[%s1945_s14 + $0x4b0] sm:$0xff]  ;;  %v792_v41 = vld [vmem:[%s1945_s14 + $0x4a8] sm:$0xff] }
  0xeb   : > { %v2193_v12 = vadd.f32 %v625_v48, %v521_v38  ;;  %v2195_v13 = vadd.f32 %v627_v57, %v523_v5  ;;  %v516_v15 = vmul.f32 %v2140_v36, %v415_v24  ;;  %v515_v16 = vmul.f32 %v2148_v39, %v415_v24  ;;  %v798_v36 = vld [vmem:[%s1945_s14 + $0x4d8] sm:$0xff]  ;;  %v791_v43 = vld [vmem:[%s1945_s14 + $0x4a0] sm:$0xff]  ;;  %v853_v47 = vld [vmem:[%s1945_s14 + $0x690] sm:$0xff] }
  0xec   : > { %1027 = vmatprep.mubr.f32.mxu0 %v632_v40  ;;  %1098 = vmatprep.mubr.f32.mxu1 %v634_v50  ;;  %v636_v17 = vadd.f32 %v626_v45, %v522_v37  ;;  %v638_v19 = vadd.f32 %v628_v54, %v524_v4  ;;  %v862_v39 = vld [vmem:[%s1945_s14 + $0x6d8] sm:$0xff]  ;;  %v855_v44 = vld [vmem:[%s1945_s14 + $0x6a0] sm:$0xff]  ;;  %v789_v54 = vld [vmem:[%s1945_s14 + $0x490] sm:$0xff] }
  0xed   : > { %1028 = vmatmul.mubr.f32.vlgmr.msra.gmra.mxu0 %v631_v53  ;;  %1099 = vmatmul.mubr.f32.vlgmr.msra.gmra.mxu1 %v633_v6  ;;  %v526_v21 = vadd.f32 %v516_v15, %v412_v28  ;;  %v525_v22 = vadd.f32 %v515_v16, %v411_v51  ;;  %v790_v45 = vld [vmem:[%s1945_s14 + $0x498] sm:$0xff]  ;;  %v788_v48 = vld [vmem:[%s1945_s14 + $0x488] sm:$0xff]  ;;  %v787_v57 = vld [vmem:[%s1945_s14 + $0x480] sm:$0xff] }
  0xee   : > { %1106 = vmatpush1.msra.mxu0 %v801_v8  ;;  %1177 = vmatpush1.msra.mxu1 %v865_v9  ;;  %v852_v56 = vld [vmem:[%s1945_s14 + $0x688] sm:$0xff]  ;;  %v851_v24 = vld [vmem:[%s1945_s14 + $0x680] sm:$0xff]  ;;  %v786_v28 = vld [vmem:[%s1945_s14 + $0x478] sm:$0xff] }
  0xef   : > { %1107 = vmatprep.subr.mxu0 %v800_v14  ;;  %1169 = vmatprep.mubr.f32.mxu0 %v636_v17  ;;  %v2207_v25 = vadd.f32 %v630_v49, %v526_v21  ;;  %v2209_v26 = vadd.f32 %v629_v52, %v525_v22  ;;  %v850_v49 = vld [vmem:[%s1945_s14 + $0x678] sm:$0xff]  ;;  %v785_v51 = vld [vmem:[%s1945_s14 + $0x470] sm:$0xff]  ;;  %v784_v55 = vld [vmem:[%s1945_s14 + $0x468] sm:$0xff] }
  0xf0   : > { %1178 = vmatprep.subr.mxu1 %v864_v18  ;;  %1240 = vmatprep.mubr.f32.mxu1 %v638_v19  ;;  %v849_v52 = vld [vmem:[%s1945_s14 + $0x670] sm:$0xff]  ;;  %v848_v58 = vld [vmem:[%s1945_s14 + $0x668] sm:$0xff]  ;;  %v783_v59 = vld [vmem:[%s1945_s14 + $0x460] sm:$0xff] }
  0xf1   : > { %1108 = vmatpush1.msra.mxu0 %v799_v20  ;;  %1179 = vmatpush1.msra.mxu1 %v863_v61  ;;  %v847_v60 = vld [vmem:[%s1945_s14 + $0x660] sm:$0xff]  ;;  %v782_v62 = vld [vmem:[%s1945_s14 + $0x458] sm:$0xff]  ;;  %v781_v7 = vld [vmem:[%s1945_s14 + $0x450] sm:$0xff] }
  0xf2   : > { %1109 = vmatprep.subr.mxu0 %v798_v36  ;;  %1180 = vmatprep.subr.mxu1 %v862_v39  ;;  %v846_v63 = vld [vmem:[%s1945_s14 + $0x658] sm:$0xff]  ;;  %v845_v1 = vld [vmem:[%s1945_s14 + $0x650] sm:$0xff]  ;;  %v780_v10 = vld [vmem:[%s1945_s14 + $0x448] sm:$0xff] }
  0xf3   : > { %1110 = vmatpush1.msra.mxu0 %v797_v0  ;;  %1181 = vmatpush1.msra.mxu1 %v861_v23  ;;  %v844_v2 = vld [vmem:[%s1945_s14 + $0x648] sm:$0xff]  ;;  %v779_v3 = vld [vmem:[%s1945_s14 + $0x440] sm:$0xff]  ;;  %v778_v37 = vld [vmem:[%s1945_s14 + $0x438] sm:$0xff] }
  0xf4   : > { %1111 = vmatprep.subr.mxu0 %v796_v27  ;;  %1182 = vmatprep.subr.mxu1 %v860_v29  ;;  %v843_v35 = vld [vmem:[%s1945_s14 + $0x640] sm:$0xff]  ;;  %v842_v4 = vld [vmem:[%s1945_s14 + $0x638] sm:$0xff]  ;;  %v777_v38 = vld [vmem:[%s1945_s14 + $0x430] sm:$0xff] }
  0xf5   : > { %1112 = vmatpush1.msra.mxu0 %v795_v30  ;;  %1183 = vmatpush1.msra.mxu1 %v859_v31  ;;  %v841_v5 = vld [vmem:[%s1945_s14 + $0x630] sm:$0xff]  ;;  %v776_v40 = vld [vmem:[%s1945_s14 + $0x428] sm:$0xff]  ;;  %v775_v53 = vld [vmem:[%s1945_s14 + $0x420] sm:$0xff] }
  0xf6   : > { %1113 = vmatprep.subr.mxu0 %v794_v32  ;;  %1184 = vmatprep.subr.mxu1 %v858_v33  ;;  %v840_v50 = vld [vmem:[%s1945_s14 + $0x628] sm:$0xff]  ;;  %v839_v6 = vld [vmem:[%s1945_s14 + $0x620] sm:$0xff]  ;;  %v774_v8 = vld [vmem:[%s1945_s14 + $0x418] sm:$0xff] }
  0xf7   : > { %1114 = vmatpush1.msra.mxu0 %v793_v11  ;;  %1185 = vmatpush1.msra.mxu1 %v857_v34  ;;  %v838_v9 = vld [vmem:[%s1945_s14 + $0x618] sm:$0xff]  ;;  %v773_v14 = vld [vmem:[%s1945_s14 + $0x410] sm:$0xff]  ;;  %v772_v16 = vld [vmem:[%s1945_s14 + $0x408] sm:$0xff] }
  0xf8   : > { %1115 = vmatprep.subr.mxu0 %v792_v41  ;;  %1186 = vmatprep.subr.mxu1 %v856_v42  ;;  %v837_v15 = vld [vmem:[%s1945_s14 + $0x610] sm:$0xff]  ;;  %v836_v17 = vld [vmem:[%s1945_s14 + $0x608] sm:$0xff]  ;;  %v771_v18 = vld [vmem:[%s1945_s14 + $0x400] sm:$0xff] }
  0xf9   : > { %1116 = vmatpush1.msra.mxu0 %v791_v43  ;;  %1187 = vmatpush1.msra.mxu1 %v855_v44  ;;  %v835_v19 = vld [vmem:[%s1945_s14 + $0x600] sm:$0xff]  ;;  %v834_v20 = vld [vmem:[%s1945_s14 + $0x5f8] sm:$0xff]  ;;  %v833_v21 = vld [vmem:[%s1945_s14 + $0x5f0] sm:$0xff] }
  0xfa   : > { %1117 = vmatprep.subr.mxu0 %v790_v45  ;;  %1188 = vmatprep.subr.mxu1 %v854_v46  ;;  %v898_v61 = vld [vmem:[%s1945_s14 + $0x7f8] sm:$0xff]  ;;  %v897_v22 = vld [vmem:[%s1945_s14 + $0x7f0] sm:$0xff]  ;;  %v832_v36 = vld [vmem:[%s1945_s14 + $0x5e8] sm:$0xff] }
  0xfb   : > { %1118 = vmatpush1.msra.mxu0 %v789_v54  ;;  %1189 = vmatpush1.msra.mxu1 %v853_v47  ;;  %v896_v39 = vld [vmem:[%s1945_s14 + $0x7e8] sm:$0xff]  ;;  %v831_v0 = vld [vmem:[%s1945_s14 + $0x5e0] sm:$0xff]  ;;  %v830_v27 = vld [vmem:[%s1945_s14 + $0x5d8] sm:$0xff] }
  0xfc   : > { %1119 = vmatprep.subr.mxu0 %v788_v48  ;;  %1190 = vmatprep.subr.mxu1 %v852_v56  ;;  %v895_v23 = vld [vmem:[%s1945_s14 + $0x7e0] sm:$0xff]  ;;  %v894_v29 = vld [vmem:[%s1945_s14 + $0x7d8] sm:$0xff]  ;;  %v829_v30 = vld [vmem:[%s1945_s14 + $0x5d0] sm:$0xff] }
  0xfd   : > { %1120 = vmatpush1.msra.mxu0 %v787_v57  ;;  %1191 = vmatpush1.msra.mxu1 %v851_v24  ;;  %v893_v31 = vld [vmem:[%s1945_s14 + $0x7d0] sm:$0xff]  ;;  %v828_v32 = vld [vmem:[%s1945_s14 + $0x5c8] sm:$0xff]  ;;  %v827_v11 = vld [vmem:[%s1945_s14 + $0x5c0] sm:$0xff] }
  0xfe   : > { %1121 = vmatprep.subr.mxu0 %v786_v28  ;;  %1192 = vmatprep.subr.mxu1 %v850_v49  ;;  %v892_v33 = vld [vmem:[%s1945_s14 + $0x7c8] sm:$0xff]  ;;  %v891_v34 = vld [vmem:[%s1945_s14 + $0x7c0] sm:$0xff]  ;;  %v826_v41 = vld [vmem:[%s1945_s14 + $0x5b8] sm:$0xff] }
  0xff   : > { %1122 = vmatpush1.msra.mxu0 %v785_v51  ;;  %1193 = vmatpush1.msra.mxu1 %v849_v52  ;;  %v890_v42 = vld [vmem:[%s1945_s14 + $0x7b8] sm:$0xff]  ;;  %v825_v43 = vld [vmem:[%s1945_s14 + $0x5b0] sm:$0xff]  ;;  %v824_v45 = vld [vmem:[%s1945_s14 + $0x5a8] sm:$0xff] }
 0x100   : > { %1123 = vmatprep.subr.mxu0 %v784_v55  ;;  %1194 = vmatprep.subr.mxu1 %v848_v58  ;;  %v889_v44 = vld [vmem:[%s1945_s14 + $0x7b0] sm:$0xff]  ;;  %v888_v46 = vld [vmem:[%s1945_s14 + $0x7a8] sm:$0xff]  ;;  %v823_v54 = vld [vmem:[%s1945_s14 + $0x5a0] sm:$0xff] }
 0x101   : > { %1124 = vmatpush1.msra.mxu0 %v783_v59  ;;  %1195 = vmatpush1.msra.mxu1 %v847_v60  ;;  %v887_v47 = vld [vmem:[%s1945_s14 + $0x7a0] sm:$0xff]  ;;  %v822_v48 = vld [vmem:[%s1945_s14 + $0x598] sm:$0xff]  ;;  %v821_v57 = vld [vmem:[%s1945_s14 + $0x590] sm:$0xff] }
 0x102   : > { %1125 = vmatprep.subr.mxu0 %v782_v62  ;;  %1196 = vmatprep.subr.mxu1 %v846_v63  ;;  %v886_v56 = vld [vmem:[%s1945_s14 + $0x798] sm:$0xff]  ;;  %v885_v24 = vld [vmem:[%s1945_s14 + $0x790] sm:$0xff]  ;;  %v820_v28 = vld [vmem:[%s1945_s14 + $0x588] sm:$0xff] }
 0x103   : > { %1126 = vmatpush1.msra.mxu0 %v781_v7  ;;  %1197 = vmatpush1.msra.mxu1 %v845_v1  ;;  %v884_v49 = vld [vmem:[%s1945_s14 + $0x788] sm:$0xff]  ;;  %v819_v51 = vld [vmem:[%s1945_s14 + $0x580] sm:$0xff]  ;;  %v818_v55 = vld [vmem:[%s1945_s14 + $0x578] sm:$0xff] }
 0x104   : > { %1127 = vmatprep.subr.mxu0 %v780_v10  ;;  %1198 = vmatprep.subr.mxu1 %v844_v2  ;;  %v883_v52 = vld [vmem:[%s1945_s14 + $0x780] sm:$0xff]  ;;  %v882_v58 = vld [vmem:[%s1945_s14 + $0x778] sm:$0xff]  ;;  %v817_v59 = vld [vmem:[%s1945_s14 + $0x570] sm:$0xff] }
 0x105   : > { %1128 = vmatpush1.msra.mxu0 %v779_v3  ;;  %1199 = vmatpush1.msra.mxu1 %v843_v35  ;;  %v881_v60 = vld [vmem:[%s1945_s14 + $0x770] sm:$0xff]  ;;  %v816_v62 = vld [vmem:[%s1945_s14 + $0x568] sm:$0xff]  ;;  %v815_v7 = vld [vmem:[%s1945_s14 + $0x560] sm:$0xff] }
 0x106   : > { %1129 = vmatprep.subr.mxu0 %v778_v37  ;;  %1200 = vmatprep.subr.mxu1 %v842_v4  ;;  %v880_v63 = vld [vmem:[%s1945_s14 + $0x768] sm:$0xff]  ;;  %v879_v1 = vld [vmem:[%s1945_s14 + $0x760] sm:$0xff]  ;;  %v814_v10 = vld [vmem:[%s1945_s14 + $0x558] sm:$0xff] }
 0x107   : > { %1130 = vmatpush1.msra.mxu0 %v777_v38  ;;  %1201 = vmatpush1.msra.mxu1 %v841_v5  ;;  %v878_v2 = vld [vmem:[%s1945_s14 + $0x758] sm:$0xff]  ;;  %v813_v3 = vld [vmem:[%s1945_s14 + $0x550] sm:$0xff]  ;;  %v812_v37 = vld [vmem:[%s1945_s14 + $0x548] sm:$0xff] }
 0x108   : > { %1131 = vmatprep.subr.mxu0 %v776_v40  ;;  %1202 = vmatprep.subr.mxu1 %v840_v50  ;;  %v877_v35 = vld [vmem:[%s1945_s14 + $0x750] sm:$0xff]  ;;  %v876_v4 = vld [vmem:[%s1945_s14 + $0x748] sm:$0xff]  ;;  %v811_v38 = vld [vmem:[%s1945_s14 + $0x540] sm:$0xff] }
 0x109   : > { %1132 = vmatpush1.msra.mxu0 %v775_v53  ;;  %1203 = vmatpush1.msra.mxu1 %v839_v6  ;;  %v875_v5 = vld [vmem:[%s1945_s14 + $0x740] sm:$0xff]  ;;  %v810_v40 = vld [vmem:[%s1945_s14 + $0x538] sm:$0xff]  ;;  %v809_v53 = vld [vmem:[%s1945_s14 + $0x530] sm:$0xff] }
 0x10a   : > { %1133 = vmatprep.subr.mxu0 %v774_v8  ;;  %1204 = vmatprep.subr.mxu1 %v838_v9  ;;  %v874_v50 = vld [vmem:[%s1945_s14 + $0x738] sm:$0xff]  ;;  %v873_v6 = vld [vmem:[%s1945_s14 + $0x730] sm:$0xff]  ;;  %v808_v8 = vld [vmem:[%s1945_s14 + $0x528] sm:$0xff] }
 0x10b   : > { %1134 = vmatpush1.msra.mxu0 %v773_v14  ;;  %1205 = vmatpush1.msra.mxu1 %v837_v15  ;;  %v872_v9 = vld [vmem:[%s1945_s14 + $0x728] sm:$0xff]  ;;  %v807_v14 = vld [vmem:[%s1945_s14 + $0x520] sm:$0xff] }
 0x10c   : > { %1135 = vmatprep.subr.mxu0 %v772_v16  ;;  %1206 = vmatprep.subr.mxu1 %v836_v17  ;;  %v871_v15 = vld [vmem:[%s1945_s14 + $0x720] sm:$0xff]  ;;  %v806_v16 = vld [vmem:[%s1945_s14 + $0x518] sm:$0xff] }
 0x10d   : > { %1136 = vmatpush1.msra.mxu0 %v771_v18  ;;  %1207 = vmatpush1.msra.mxu1 %v835_v19  ;;  %v870_v17 = vld [vmem:[%s1945_s14 + $0x718] sm:$0xff]  ;;  %v805_v18 = vld [vmem:[%s1945_s14 + $0x510] sm:$0xff] }
 0x10e   : > { %1137 = vmatprep.subr.mxu0 %v834_v20  ;;  %1208 = vmatprep.subr.mxu1 %v898_v61  ;;  %v869_v19 = vld [vmem:[%s1945_s14 + $0x710] sm:$0xff]  ;;  %v804_v20 = vld [vmem:[%s1945_s14 + $0x508] sm:$0xff] }
 0x10f   : > { %1138 = vmatpush2.msra.mxu0 %v833_v21  ;;  %1209 = vmatpush2.msra.mxu1 %v897_v22  ;;  %v868_v61 = vld [vmem:[%s1945_s14 + $0x708] sm:$0xff]  ;;  %v803_v21 = vld [vmem:[%s1945_s14 + $0x500] sm:$0xff] }
 0x110   : > { %1139 = vmatprep.subr.mxu0 %v832_v36  ;;  %1210 = vmatprep.subr.mxu1 %v896_v39  ;;  %v867_v22 = vld [vmem:[%s1945_s14 + $0x700] sm:$0xff]  ;;  %v930_v36 = vld [vmem:[%s1945_s14 + $0x8f8] sm:$0xff]  ;;  %v929_v39 = vld [vmem:[%s1945_s14 + $0x8f0] sm:$0xff] }
 0x111   : > { %1140 = vmatpush2.msra.mxu0 %v831_v0  ;;  %1211 = vmatpush2.msra.mxu1 %v895_v23  ;;  %v928_v0 = vld [vmem:[%s1945_s14 + $0x8e8] sm:$0xff]  ;;  %v927_v23 = vld [vmem:[%s1945_s14 + $0x8e0] sm:$0xff] }
 0x112   : > { %1141 = vmatprep.subr.mxu0 %v830_v27  ;;  %1212 = vmatprep.subr.mxu1 %v894_v29  ;;  %v926_v27 = vld [vmem:[%s1945_s14 + $0x8d8] sm:$0xff]  ;;  %v925_v29 = vld [vmem:[%s1945_s14 + $0x8d0] sm:$0xff] }
 0x113   : > { %1142 = vmatpush2.msra.mxu0 %v829_v30  ;;  %1213 = vmatpush2.msra.mxu1 %v893_v31  ;;  %v924_v30 = vld [vmem:[%s1945_s14 + $0x8c8] sm:$0xff]  ;;  %v921_v31 = vld [vmem:[%s1945_s14 + $0x8b0] sm:$0xff] }
 0x114   : > { %1143 = vmatprep.subr.mxu0 %v828_v32  ;;  %1214 = vmatprep.subr.mxu1 %v892_v33  ;;  %v919_v32 = vld [vmem:[%s1945_s14 + $0x8a0] sm:$0xff]  ;;  %v918_v33 = vld [vmem:[%s1945_s14 + $0x898] sm:$0xff] }
 0x115   : > { %1144 = vmatpush2.msra.mxu0 %v827_v11  ;;  %1215 = vmatpush2.msra.mxu1 %v891_v34  ;;  %v917_v11 = vld [vmem:[%s1945_s14 + $0x890] sm:$0xff]  ;;  %v916_v34 = vld [vmem:[%s1945_s14 + $0x888] sm:$0xff] }
 0x116   : > { %1145 = vmatprep.subr.mxu0 %v826_v41  ;;  %1216 = vmatprep.subr.mxu1 %v890_v42  ;;  %v915_v41 = vld [vmem:[%s1945_s14 + $0x880] sm:$0xff]  ;;  %v914_v42 = vld [vmem:[%s1945_s14 + $0x878] sm:$0xff] }
 0x117   : > { %1146 = vmatpush2.msra.mxu0 %v825_v43  ;;  %1217 = vmatpush2.msra.mxu1 %v889_v44  ;;  %v913_v43 = vld [vmem:[%s1945_s14 + $0x870] sm:$0xff]  ;;  %v912_v44 = vld [vmem:[%s1945_s14 + $0x868] sm:$0xff] }
 0x118   : > { %1147 = vmatprep.subr.mxu0 %v824_v45  ;;  %1218 = vmatprep.subr.mxu1 %v888_v46  ;;  %v911_v45 = vld [vmem:[%s1945_s14 + $0x860] sm:$0xff]  ;;  %v910_v46 = vld [vmem:[%s1945_s14 + $0x858] sm:$0xff] }
 0x119   : > { %1148 = vmatpush2.msra.mxu0 %v823_v54  ;;  %1219 = vmatpush2.msra.mxu1 %v887_v47  ;;  %v909_v54 = vld [vmem:[%s1945_s14 + $0x850] sm:$0xff]  ;;  %v908_v47 = vld [vmem:[%s1945_s14 + $0x848] sm:$0xff] }
 0x11a   : > { %1149 = vmatprep.subr.mxu0 %v822_v48  ;;  %1220 = vmatprep.subr.mxu1 %v886_v56  ;;  %v907_v48 = vld [vmem:[%s1945_s14 + $0x840] sm:$0xff]  ;;  %v906_v56 = vld [vmem:[%s1945_s14 + $0x838] sm:$0xff] }
 0x11b   : > { %1150 = vmatpush2.msra.mxu0 %v821_v57  ;;  %1221 = vmatpush2.msra.mxu1 %v885_v24  ;;  %v905_v57 = vld [vmem:[%s1945_s14 + $0x830] sm:$0xff]  ;;  %v904_v24 = vld [vmem:[%s1945_s14 + $0x828] sm:$0xff] }
 0x11c   : > { %1151 = vmatprep.subr.mxu0 %v820_v28  ;;  %1222 = vmatprep.subr.mxu1 %v884_v49  ;;  %v903_v28 = vld [vmem:[%s1945_s14 + $0x820] sm:$0xff]  ;;  %v902_v49 = vld [vmem:[%s1945_s14 + $0x818] sm:$0xff] }
 0x11d   : > { %1152 = vmatpush2.msra.mxu0 %v819_v51  ;;  %1223 = vmatpush2.msra.mxu1 %v883_v52  ;;  %v901_v51 = vld [vmem:[%s1945_s14 + $0x810] sm:$0xff]  ;;  %v900_v52 = vld [vmem:[%s1945_s14 + $0x808] sm:$0xff] }
 0x11e   : > { %1153 = vmatprep.subr.mxu0 %v818_v55  ;;  %1224 = vmatprep.subr.mxu1 %v882_v58  ;;  %v899_v55 = vld [vmem:[%s1945_s14 + $0x800] sm:$0xff]  ;;  %v962_v58 = vld [vmem:[%s1945_s14 + $0x9f8] sm:$0xff] }
 0x11f   : > { %1154 = vmatpush2.msra.mxu0 %v817_v59  ;;  %1225 = vmatpush2.msra.mxu1 %v881_v60  ;;  %v961_v59 = vld [vmem:[%s1945_s14 + $0x9f0] sm:$0xff]  ;;  %v960_v60 = vld [vmem:[%s1945_s14 + $0x9e8] sm:$0xff] }
 0x120   : > { %1155 = vmatprep.subr.mxu0 %v816_v62  ;;  %1226 = vmatprep.subr.mxu1 %v880_v63  ;;  %v959_v62 = vld [vmem:[%s1945_s14 + $0x9e0] sm:$0xff]  ;;  %v958_v63 = vld [vmem:[%s1945_s14 + $0x9d8] sm:$0xff] }
 0x121   : > { %1156 = vmatpush2.msra.mxu0 %v815_v7  ;;  %1227 = vmatpush2.msra.mxu1 %v879_v1  ;;  %v957_v7 = vld [vmem:[%s1945_s14 + $0x9d0] sm:$0xff]  ;;  %v956_v1 = vld [vmem:[%s1945_s14 + $0x9c8] sm:$0xff] }
 0x122   : > { %1157 = vmatprep.subr.mxu0 %v814_v10  ;;  %1228 = vmatprep.subr.mxu1 %v878_v2  ;;  %v955_v10 = vld [vmem:[%s1945_s14 + $0x9c0] sm:$0xff]  ;;  %v954_v2 = vld [vmem:[%s1945_s14 + $0x9b8] sm:$0xff] }
 0x123   : > { %1158 = vmatpush2.msra.mxu0 %v813_v3  ;;  %1229 = vmatpush2.msra.mxu1 %v877_v35  ;;  %v953_v3 = vld [vmem:[%s1945_s14 + $0x9b0] sm:$0xff]  ;;  %v952_v35 = vld [vmem:[%s1945_s14 + $0x9a8] sm:$0xff] }
 0x124   : > { %1159 = vmatprep.subr.mxu0 %v812_v37  ;;  %1230 = vmatprep.subr.mxu1 %v876_v4  ;;  %v951_v37 = vld [vmem:[%s1945_s14 + $0x9a0] sm:$0xff]  ;;  %v950_v4 = vld [vmem:[%s1945_s14 + $0x998] sm:$0xff] }
 0x125   : > { %1160 = vmatpush2.msra.mxu0 %v811_v38  ;;  %1231 = vmatpush2.msra.mxu1 %v875_v5  ;;  %v949_v38 = vld [vmem:[%s1945_s14 + $0x990] sm:$0xff]  ;;  %v948_v5 = vld [vmem:[%s1945_s14 + $0x988] sm:$0xff] }
 0x126   : > { %1161 = vmatprep.subr.mxu0 %v810_v40  ;;  %1232 = vmatprep.subr.mxu1 %v874_v50  ;;  %v947_v40 = vld [vmem:[%s1945_s14 + $0x980] sm:$0xff]  ;;  %v946_v50 = vld [vmem:[%s1945_s14 + $0x978] sm:$0xff] }
 0x127   : > { %1162 = vmatpush2.msra.mxu0 %v809_v53  ;;  %1233 = vmatpush2.msra.mxu1 %v873_v6  ;;  %v945_v53 = vld [vmem:[%s1945_s14 + $0x970] sm:$0xff]  ;;  %v944_v6 = vld [vmem:[%s1945_s14 + $0x968] sm:$0xff] }
 0x128   : > { %1163 = vmatprep.subr.mxu0 %v808_v8  ;;  %1234 = vmatprep.subr.mxu1 %v872_v9  ;;  %v943_v8 = vld [vmem:[%s1945_s14 + $0x960] sm:$0xff]  ;;  %v942_v9 = vld [vmem:[%s1945_s14 + $0x958] sm:$0xff] }
 0x129   : > { %1164 = vmatpush2.msra.mxu0 %v807_v14  ;;  %1235 = vmatpush2.msra.mxu1 %v871_v15  ;;  %v941_v14 = vld [vmem:[%s1945_s14 + $0x950] sm:$0xff]  ;;  %v940_v15 = vld [vmem:[%s1945_s14 + $0x948] sm:$0xff] }
 0x12a   : > { %1165 = vmatprep.subr.mxu0 %v806_v16  ;;  %1236 = vmatprep.subr.mxu1 %v870_v17  ;;  %v939_v16 = vld [vmem:[%s1945_s14 + $0x940] sm:$0xff]  ;;  %v938_v17 = vld [vmem:[%s1945_s14 + $0x938] sm:$0xff] }
 0x12b   : > { %1166 = vmatpush2.msra.mxu0 %v805_v18  ;;  %1237 = vmatpush2.msra.mxu1 %v869_v19  ;;  %v937_v18 = vld [vmem:[%s1945_s14 + $0x930] sm:$0xff]  ;;  %v936_v19 = vld [vmem:[%s1945_s14 + $0x928] sm:$0xff] }
 0x12c   : > { %1167 = vmatprep.subr.mxu0 %v804_v20  ;;  %1238 = vmatprep.subr.mxu1 %v868_v61  ;;  %v935_v20 = vld [vmem:[%s1945_s14 + $0x920] sm:$0xff]  ;;  %v934_v61 = vld [vmem:[%s1945_s14 + $0x918] sm:$0xff] }
 0x12d   : > { %1168 = vmatpush2.msra.mxu0 %v803_v21  ;;  %1239 = vmatpush2.msra.mxu1 %v867_v22  ;;  %v933_v21 = vld [vmem:[%s1945_s14 + $0x910] sm:$0xff]  ;;  %v932_v22 = vld [vmem:[%s1945_s14 + $0x908] sm:$0xff] }
 0x12e   : > { %1170 = vmatmul.mubr.f32.vlgmr.msra.gmra.mxu0 %v2193_v12  ;;  %1241 = vmatmul.mubr.f32.vlgmr.msra.gmra.mxu1 %v2195_v13  ;;  %v923_v12 = vld [vmem:[%s1945_s14 + $0x8c0] sm:$0xff]  ;;  %v922_v13 = vld [vmem:[%s1945_s14 + $0x8b8] sm:$0xff] }
 0x12f   : > { %1247 = vmatprep.subr.mxu0 %v930_v36  ;;  %1311 = vmatprep.mubr.f32.mxu0 %v2207_v25  ;;  %v920_v25 = vld [vmem:[%s1945_s14 + $0x8a8] sm:$0xff]  ;;  %v931_v36 = vld [vmem:[%s1945_s14 + $0x900] sm:$0xff]  ;;  %s2488_s14 = sld [smem:[#allocation17_spill]] }
 0x130   : > { %1248 = vmatpush1.msra.mxu0 %v929_v39 }
 0x131   : > { %1249 = vmatprep.subr.mxu0 %v928_v0 }
 0x132   : > { %1250 = vmatpush1.msra.mxu0 %v927_v23 }
 0x133   : > { %1251 = vmatprep.subr.mxu0 %v926_v27 }
 0x134   : > { %1252 = vmatpush1.msra.mxu0 %v925_v29 }
 0x135   : > { %1253 = vmatprep.subr.mxu0 %v924_v30  ;;  %s1335_s30 = scalar_lea.hbm %s2488_s14, %s1465_s21 }
 0x136   : > { %1254 = vmatpush1.msra.mxu0 %v923_v12 }
 0x137   : > { %1255 = vmatprep.subr.mxu0 %v922_v13 }
 0x138   : > { %1256 = vmatpush1.msra.mxu0 %v921_v31 }
 0x139   : > { %1257 = vmatprep.subr.mxu0 %v920_v25 }
 0x13a   : > { %1258 = vmatpush1.msra.mxu0 %v919_v32 }
 0x13b   : > { %1259 = vmatprep.subr.mxu0 %v918_v33 }
 0x13c   : > { %1260 = vmatpush1.msra.mxu0 %v917_v11 }
 0x13d   : > { %1261 = vmatprep.subr.mxu0 %v916_v34 }
 0x13e   : > { %1262 = vmatpush1.msra.mxu0 %v915_v41 }
 0x13f   : > { %1263 = vmatprep.subr.mxu0 %v914_v42 }
 0x140   : > { %1264 = vmatpush1.msra.mxu0 %v913_v43  ;;  %v642_v43 = vld [vmem:[%s1966_s28 + $0x8] sm:$0xff] }
 0x141   : > { %1265 = vmatprep.subr.mxu0 %v912_v44 }
 0x142   : > { %1266 = vmatpush1.msra.mxu0 %v911_v45 }
 0x143   : > { %1267 = vmatprep.subr.mxu0 %v910_v46 }
 0x144   : > { %1268 = vmatpush1.msra.mxu0 %v909_v54 }
 0x145   : > { %1269 = vmatprep.subr.mxu0 %v908_v47 }
 0x146   : > { %1270 = vmatpush1.msra.mxu0 %v907_v48 }
 0x147   : > { %1271 = vmatprep.subr.mxu0 %v906_v56 }
 0x148   : > { %1272 = vmatpush1.msra.mxu0 %v905_v57 }
 0x149   : > { %1273 = vmatprep.subr.mxu0 %v904_v24 }
 0x14a   : > { %1274 = vmatpush1.msra.mxu0 %v903_v28 }
 0x14b   : > { %1275 = vmatprep.subr.mxu0 %v902_v49 }
 0x14c   : > { %1276 = vmatpush1.msra.mxu0 %v901_v51 }
 0x14d   : > { %1277 = vmatprep.subr.mxu0 %v900_v52 }
 0x14e   : > { %1278 = vmatpush1.msra.mxu0 %v899_v55 }
 0x14f   : > { %1279 = vmatprep.subr.mxu0 %v962_v58 }
 0x150   : > { %1280 = vmatpush2.msra.mxu0 %v961_v59 }
 0x151   : > { %1281 = vmatprep.subr.mxu0 %v960_v60 }
 0x152   : > { %1282 = vmatpush2.msra.mxu0 %v959_v62 }
 0x153   : > { %1283 = vmatprep.subr.mxu0 %v958_v63 }
 0x154   : > { %1284 = vmatpush2.msra.mxu0 %v957_v7 }
 0x155   : > { %1285 = vmatprep.subr.mxu0 %v956_v1 }
 0x156   : > { %1286 = vmatpush2.msra.mxu0 %v955_v10 }
 0x157   : > { %1287 = vmatprep.subr.mxu0 %v954_v2 }
 0x158   : > { %1288 = vmatpush2.msra.mxu0 %v953_v3 }
 0x159   : > { %1289 = vmatprep.subr.mxu0 %v952_v35 }
 0x15a   : > { %1290 = vmatpush2.msra.mxu0 %v951_v37 }
 0x15b   : > { %1291 = vmatprep.subr.mxu0 %v950_v4 }
 0x15c   : > { %1292 = vmatpush2.msra.mxu0 %v949_v38 }
 0x15d   : > { %1293 = vmatprep.subr.mxu0 %v948_v5 }
 0x15e   : > { %1294 = vmatpush2.msra.mxu0 %v947_v40 }
 0x15f   : > { %1295 = vmatprep.subr.mxu0 %v946_v50 }
 0x160   : > { %1296 = vmatpush2.msra.mxu0 %v945_v53 }
 0x161   : > { %1297 = vmatprep.subr.mxu0 %v944_v6 }
 0x162   : > { %1298 = vmatpush2.msra.mxu0 %v943_v8 }
 0x163   : > { %1299 = vmatprep.subr.mxu0 %v942_v9 }
 0x164   : > { %1300 = vmatpush2.msra.mxu0 %v941_v14 }
 0x165   : > { %1301 = vmatprep.subr.mxu0 %v940_v15 }
 0x166   : > { %1302 = vmatpush2.msra.mxu0 %v939_v16 }
 0x167   : > { %1303 = vmatprep.subr.mxu0 %v938_v17 }
 0x168   : > { %1304 = vmatpush2.msra.mxu0 %v937_v18 }
 0x169   : > { %1305 = vmatprep.subr.mxu0 %v936_v19 }
 0x16a   : > { %1306 = vmatpush2.msra.mxu0 %v935_v20 }
 0x16b   : > { %1307 = vmatprep.subr.mxu0 %v934_v61 }
 0x16c   : > { %1308 = vmatpush2.msra.mxu0 %v933_v21 }
 0x16d   : > { %1309 = vmatprep.subr.mxu0 %v932_v22 }
 0x16e   : > { %1310 = vmatpush2.msra.mxu0 %v931_v36 }
 0x16f   : > { %1312 = vmatmul.mubr.f32.vlgmr.msra.gmra.mxu0 %v2209_v26  ;;  %v641_v26 = vld [vmem:[%s1966_s28] sm:$0xff] }
 0x1ad   : > { %v1029_v39 = vpop.f32.mrf.mxu0  ;;  %v1100_v0 = vpop.f32.mrf.mxu1 }
 0x1ae   : > { %v1101_v30 = vadd.f32 %v1100_v0, %v1029_v39 }
 0x1af   : > { %v1031_v23 = vpop.f32.mrf.mxu0  ;;  %v1102_v29 = vpop.f32.mrf.mxu1 }
 0x1b0   : > { %v1103_v13 = vadd.f32 %v1102_v29, %v1031_v23 }
 0x1ee   : > { %v1171_v27 = vpop.f32.mrf.mxu0  ;;  %v1242_v25 = vpop.f32.mrf.mxu1 }
 0x1ef   : > { %v1172_v31 = vadd.f32 %v1171_v27, %v1101_v30 }
 0x1f0   : > { %v1173_v12 = vpop.f32.mrf.mxu0  ;;  %v1244_v11 = vpop.f32.mrf.mxu1 }
 0x1f1   : > { %v1174_v32 = vadd.f32 %v1173_v12, %v1103_v13  ;;  %v1243_v33 = vadd.f32 %v1242_v25, %v1172_v31 }
 0x1f3   : > { %v1245_v41 = vadd.f32 %v1244_v11, %v1174_v32 }
 0x22f   : > { %v1313_v34 = vpop.f32.mrf.mxu0 }
 0x230   : > { %v1314_v42 = vadd.f32 %v1313_v34, %v1243_v33 }
 0x231   : > { %v1315_v44 = vpop.f32.mrf.mxu0 }
 0x232   : > { %v1318_v45 = vadd.f32 %v1314_v42, %v641_v26  ;;  %v1316_v46 = vadd.f32 %v1315_v44, %v1245_v41 }
 0x234   : > { %1320 = vst [vmem:[%s1966_s28] sm:$0xff] %v1318_v45  ;;  %v1319_v54 = vadd.f32 %v1316_v46, %v642_v43 }
 0x236   : > { %1321 = vst [vmem:[%s1966_s28 + $0x8] sm:$0xff] %v1319_v54 }
 0x237   : > { %1659 = shalt.err (!%p1656_p11)
}
 0x238   : > { %s1660_s13 = scalar_lea.hbm %s1335_s30, 256  ;;  %s1664_s18 = scalar_lea.hbm %s2488_s14, 1024 }
 0x239   : > { %p1661_p13 = scmp.ne.s32.totalorder %s1335_s30, %s1660_s13  ;;  %p1665_p7 = scmp.lt.s32.totalorder %s1335_s30, %s2488_s14 }
 0x23a   : > { %p1666_p10 = scmp.lt.s32.totalorder %s1664_s18, %s1660_s13 }
 0x23b   : > { %p1662_p4 = pnand %p1661_p13, %p2489_p0 }
 0x23c   : > { %p1667_p3 = por %p1666_p10, %p1665_p7 }
 0x23d   : > { %p1663_p6 = pneg %p1662_p4 }
 0x23f   : > { %p1668_p12 = pnand %p1667_p3, %p1663_p6 }
 0x241   : > { %1671 = shalt.err (!%p1668_p12)
}
 0x242   : > { %1476 = dma.vmem_to_hbm [thread:$0]  (%p2489_p0), %s1338_s15, 256, %s1335_s30, %s1323_s9  }
 0x243 PF: > { %s2490_s3 = sld [smem:[#allocation12_spill]] }
 0x244   : > { %s2491_s4 = sld [smem:[#allocation11_spill]] }
 0x245   : > { %s2492_s21 = sld [smem:[#allocation13_spill]] }
 0x249   : > { %p1493_p1 = scmp.ge.s32.totalorder %s2490_s3, 2 }
 0x24a   : > { %s1349_s8 = sand.u32 1, %s2491_s4  }
 0x24b   : > { %p2493_p2 = scmp.ne.s32.totalorder %s2492_s21, 0  ;;  %s1350_s5 = scalar_lea.sflag [#allocation4], %s1349_s8 }
 0x24d   : > { %p1487_p5 = pnand %p1493_p1, %p2493_p2 }
 0x24f   : > { %p1488_p8 = pneg %p1487_p5 }
 0x251   : > { %1725 = dma.done.wait (%p1488_p8), %s1350_s5, 256  }
 0x252   : > { %1727 = vsyncadd (%p1488_p8), %s1350_s5, 4294967040  ;;  %s21_s25 = sadd.s32 1, %s2490_s3   ;;  %s2494_s7 = sld [smem:[#allocation14_spill]] }
 0x253   : > { %p18_p9 = scmp.ge.s32.totalorder %s21_s25, 18   ;;  %s2495_s30 = sld [smem:[#allocation15_spill]] }
 0x254   : > { %s2496_s15 = smov %s1734_s16  ;;  %s2497_s16 = smov %s1738_s17 }
 0x255   : > { %s2498_s17 = smov %s1936_s26  ;;  %s2499_s18 = smov %s1746_s19 }
 0x256   : > { %s2500_s19 = smov %s1750_s20  ;;  %s2501_s20 = smov %s1926_s11 }
 0x257   : > { %s2502_s21 = smov %s1762_s23  ;;  %s2503_s22 = smov %s1766_s24 }
 0x258   : > { %s2504_s23 = smov %s2494_s7  ;;  %20 = sbr.rel (!%p18_p9) target bundleno = 13 (0xd), region = 92 }
 0x259   : > { %s2505_s24 = smov %s2495_s30 }
 0x25d   :  { %1355 = vsyncpa [#allocation3], 1 }
 0x25e   :  { %1357 = vsyncpa [#allocation3 + $0x1], 1 }
 0x25f   :  { %1358 = vsyncpa [#allocation6], 1 }
 0x260   :  { %1359 = vsyncpa [#allocation4], 1 }
 0x261   :  { %1361 = vsyncpa [#allocation4 + $0x1], 1 }

</bundles_post_ra>
